<compile_context>
chip_gen: v5e
topology: v5e:2x2
jax: 0.10.0
libtpu: 0.0.40
codegen_flags: <defaults>
</compile_context>

<pallas_src>
import numpy as np
import jax
import jax.numpy as jnp
from jax.experimental import pallas as pl
from jax.experimental.pallas import tpu as pltpu

P = 8          # patch size          (real ViT: 16)
G = 8          # patches per side    (real ViT: 14)
H = P * G      # image side          (real ViT: 224)
C = 3          # RGB channels
D = 32         # embedding dim       (real ViT: 768)
PP = P * P     # pixels per patch (= number of (i, j) positions)
N = G * G      # number of patches

N_TILE = 32    # patches per grid step    (divides N; multiple of 8)
D_TILE = 8     # embed dims per grid step (divides D; multiple of 8)
assert N % N_TILE == 0 and D % D_TILE == 0
assert N_TILE % 8 == 0 and D_TILE % 8 == 0


def _embed_mask_kernel(p_ref, w_ref, o_ref):
    """p_ref: (C, N_TILE, PP), w_ref: (C, D_TILE, PP), o_ref: (N_TILE, PP).

    o[n, ij] += sum_{d in tile} | sum_c p[c, n, ij] * w[c, d, ij] |
    """
    d_step = pl.program_id(1)

    @pl.when(d_step == 0)
    def _():
        o_ref[...] = jnp.zeros_like(o_ref)

    # slab[d, n, ij] = sum_c p[c, n, ij] * w[c, d, ij]
    # p broadcast over the *leading* d axis (free); w sublane-broadcast over n.
    slab = p_ref[0][None, :, :] * w_ref[0][:, None, :]
    for c in range(1, C):
        slab = slab + p_ref[c][None, :, :] * w_ref[c][:, None, :]

    # Reduce over the leading d-tile axis: pure VALU adds, no XLU cross-lane reduce.
    o_ref[...] += jnp.sum(jnp.abs(slab), axis=0)


@jax.jit
def embed_position(image, conv_w, conv_b):
    """Pallas implementation of EMBED_POSITION.forward for a single image.

    image : (1, C, H, H)  NCHW, like the torch module
    conv_w: (D, C, P, P)  patch_embed Conv2d weight
    conv_b: (D,)          patch_embed Conv2d bias (cancels in origin - new_embed)
    """
    del conv_b  # cancels algebraically in origin_embed - new_embed
    img = image[0].astype(jnp.float32)

    # p[c, n, ij]: pixel of channel c, patch n=(x*G+y), in-patch position ij=(u*P+v)
    p = (img.reshape(C, G, P, G, P)        # (c, x, u, y, v)
            .transpose(0, 1, 3, 2, 4)      # (c, x, y, u, v)
            .reshape(C, N, PP))
    # w[c, d, ij] = conv_w[d, c, u, v]   (im2col-flattened conv weight, D leading)
    w = conv_w.astype(jnp.float32).reshape(D, C, PP).transpose(1, 0, 2)

    mask_npp = pl.pallas_call(
        _embed_mask_kernel,
        out_shape=jax.ShapeDtypeStruct((N, PP), jnp.float32),
        grid_spec=pltpu.PrefetchScalarGridSpec(
            num_scalar_prefetch=0,
            grid=(N // N_TILE, D // D_TILE),       # reduction (d) axis last
            in_specs=[
                # p tile: resident across the d axis (same block index for all d)
                pl.BlockSpec((C, N_TILE, PP), lambda n, d: (0, n, 0)),
                # w tile: streamed / double-buffered along the d axis
                pl.BlockSpec((C, D_TILE, PP), lambda n, d: (0, d, 0)),
            ],
            # output block constant in d -> resident accumulator across the d axis
            out_specs=pl.BlockSpec((N_TILE, PP), lambda n, d: (n, 0)),
        ),
        compiler_params=pltpu.CompilerParams(
            dimension_semantics=("parallel", "arbitrary"),
            vmem_limit_bytes=32 * 1024 * 1024,
        ),
    )(p, w)

    # scatter back: mask[x*P + i, y*P + j] = mask_npp[x*G + y, i*P + j]
    mask = (mask_npp.reshape(G, G, P, P)   # (x, y, i, j)
                    .transpose(0, 2, 1, 3)  # (x, i, y, j)
                    .reshape(H, H))
    # embed_mask_2 -= min; embed_mask_2 /= max  (no zero-guard, matches reference)
    mask = mask - jnp.min(mask)
    mask = mask / jnp.max(mask)
    return mask


def _reference(image, conv_w, conv_b):
    """Literal (vectorized over patches) numpy re-implementation of the torch loop."""
    CPP = C * P * P
    img = np.asarray(image, np.float64)[0]
    w = np.asarray(conv_w, np.float64).reshape(D, CPP).T
    b = np.asarray(conv_b, np.float64)
    patches = (img.reshape(C, G, P, G, P)
                  .transpose(1, 3, 0, 2, 4)
                  .reshape(N, CPP))
    origin = patches @ w + b
    mask = np.zeros((H, H), np.float64)
    for i in range(P):
        for j in range(P):
            ij = i * P + j
            keep = (np.arange(CPP) % (P * P)) != ij
            new_embed = (patches * keep) @ w + b
            diff = np.sqrt((origin - new_embed) ** 2)
            s = diff.sum(axis=-1)
            mask[i::P, j::P] = s.reshape(G, G)
    mask -= mask.min()
    mask /= mask.max()
    return mask


if __name__ == "__main__":
    # TODO(synk): the original module loads a timm pretrained model, reads images
    # from disk (PIL) and a labels CSV, and np.save's results; here we use one
    # synthetic image and deterministic synthetic patch_embed weights instead.
    key = jax.random.PRNGKey(0)
    k_img, k_w, k_b = jax.random.split(key, 3)
    image = jax.random.normal(k_img, (1, C, H, H), jnp.float32)      # NCHW
    conv_w = jax.random.normal(k_w, (D, C, P, P), jnp.float32) * 0.02
    conv_b = jax.random.normal(k_b, (D,), jnp.float32) * 0.02

    mask = jax.block_until_ready(embed_position(image, conv_w, conv_b))

    ref = _reference(image, conv_w, conv_b)
    np.testing.assert_allclose(np.asarray(mask), ref, rtol=1e-3, atol=1e-3)
    print("KERNEL_OK")
</pallas_src>

<mosaic_0001>
module attributes {stable_mosaic.version = 11 : i64} {
  func.func @_embed_mask_kernel(%arg0: i32, %arg1: i32, %arg2: memref<3x32x64xf32, #tpu.memory_space<vmem>>, %arg3: memref<3x8x64xf32, #tpu.memory_space<vmem>>, %arg4: memref<32x64xf32, #tpu.memory_space<vmem>>) attributes {dimension_semantics = [#tpu.dimension_semantics<parallel>, #tpu.dimension_semantics<arbitrary>], iteration_bounds = array<i64: 2, 4>, scalar_prefetch = 0 : i64, scratch_operands = 0 : i64, tpu.core_type = #tpu.core_type<tc>, window_params = [{transform_indices = @transform_0, window_bounds = array<i64: 3, 32, 64>}, {transform_indices = @transform_1, window_bounds = array<i64: 3, 8, 64>}, {transform_indices = @transform_2, window_bounds = array<i64: 32, 64>}]} {
    %c0_i32 = arith.constant 0 : i32
    %0 = arith.cmpi eq, %arg1, %c0_i32 : i32
    %1 = arith.extui %0 : i1 to i32
    %c0_i32_0 = arith.constant 0 : i32
    %2 = arith.cmpi ne, %1, %c0_i32_0 : i32
    scf.if %2 {
      %cst_20 = arith.constant 0.000000e+00 : f32
      %37 = vector.broadcast %cst_20 : f32 to vector<32x64xf32>
      %c0_21 = arith.constant 0 : index
      %c0_22 = arith.constant 0 : index
      %38 = vector.load %arg4[%c0_21, %c0_22] : memref<32x64xf32, #tpu.memory_space<vmem>>, vector<32x64xf32>
      tpu.vector_store %arg4[%c0_21, %c0_22], %37 {strides = array<i32>} : memref<32x64xf32, #tpu.memory_space<vmem>>, vector<32x64xf32>,
    } else {
    }
    %c0 = arith.constant 0 : index
    %c0_1 = arith.constant 0 : index
    %c0_2 = arith.constant 0 : index
    %3 = vector.load %arg2[%c0, %c0_1, %c0_2] : memref<3x32x64xf32, #tpu.memory_space<vmem>>, vector<1x32x64xf32>
    %4 = vector.shape_cast %3 : vector<1x32x64xf32> to vector<32x64xf32>
    %5 = vector.shape_cast %4 : vector<32x64xf32> to vector<1x32x64xf32>
    %c0_3 = arith.constant 0 : index
    %c0_4 = arith.constant 0 : index
    %c0_5 = arith.constant 0 : index
    %6 = vector.load %arg3[%c0_3, %c0_4, %c0_5] : memref<3x8x64xf32, #tpu.memory_space<vmem>>, vector<1x8x64xf32>
    %7 = vector.shape_cast %6 : vector<1x8x64xf32> to vector<8x64xf32>
    %8 = vector.shape_cast %7 : vector<8x64xf32> to vector<8x1x64xf32>
    %9 = vector.broadcast %5 : vector<1x32x64xf32> to vector<8x32x64xf32>
    %10 = vector.broadcast %8 : vector<8x1x64xf32> to vector<8x32x64xf32>
    %11 = arith.mulf %9, %10 : vector<8x32x64xf32>
    %c1 = arith.constant 1 : index
    %c0_6 = arith.constant 0 : index
    %c0_7 = arith.constant 0 : index
    %12 = vector.load %arg2[%c1, %c0_6, %c0_7] : memref<3x32x64xf32, #tpu.memory_space<vmem>>, vector<1x32x64xf32>
    %13 = vector.shape_cast %12 : vector<1x32x64xf32> to vector<32x64xf32>
    %14 = vector.shape_cast %13 : vector<32x64xf32> to vector<1x32x64xf32>
    %c1_8 = arith.constant 1 : index
    %c0_9 = arith.constant 0 : index
    %c0_10 = arith.constant 0 : index
    %15 = vector.load %arg3[%c1_8, %c0_9, %c0_10] : memref<3x8x64xf32, #tpu.memory_space<vmem>>, vector<1x8x64xf32>
    %16 = vector.shape_cast %15 : vector<1x8x64xf32> to vector<8x64xf32>
    %17 = vector.shape_cast %16 : vector<8x64xf32> to vector<8x1x64xf32>
    %18 = vector.broadcast %14 : vector<1x32x64xf32> to vector<8x32x64xf32>
    %19 = vector.broadcast %17 : vector<8x1x64xf32> to vector<8x32x64xf32>
    %20 = arith.mulf %18, %19 : vector<8x32x64xf32>
    %21 = arith.addf %11, %20 : vector<8x32x64xf32>
    %c2 = arith.constant 2 : index
    %c0_11 = arith.constant 0 : index
    %c0_12 = arith.constant 0 : index
    %22 = vector.load %arg2[%c2, %c0_11, %c0_12] : memref<3x32x64xf32, #tpu.memory_space<vmem>>, vector<1x32x64xf32>
    %23 = vector.shape_cast %22 : vector<1x32x64xf32> to vector<32x64xf32>
    %24 = vector.shape_cast %23 : vector<32x64xf32> to vector<1x32x64xf32>
    %c2_13 = arith.constant 2 : index
    %c0_14 = arith.constant 0 : index
    %c0_15 = arith.constant 0 : index
    %25 = vector.load %arg3[%c2_13, %c0_14, %c0_15] : memref<3x8x64xf32, #tpu.memory_space<vmem>>, vector<1x8x64xf32>
    %26 = vector.shape_cast %25 : vector<1x8x64xf32> to vector<8x64xf32>
    %27 = vector.shape_cast %26 : vector<8x64xf32> to vector<8x1x64xf32>
    %28 = vector.broadcast %24 : vector<1x32x64xf32> to vector<8x32x64xf32>
    %29 = vector.broadcast %27 : vector<8x1x64xf32> to vector<8x32x64xf32>
    %30 = arith.mulf %28, %29 : vector<8x32x64xf32>
    %31 = arith.addf %21, %30 : vector<8x32x64xf32>
    %c0_16 = arith.constant 0 : index
    %c0_17 = arith.constant 0 : index
    %32 = vector.load %arg4[%c0_16, %c0_17] : memref<32x64xf32, #tpu.memory_space<vmem>>, vector<32x64xf32>
    %33 = math.absf %31 : vector<8x32x64xf32>
    %cst = arith.constant dense<0.000000e+00> : vector<32x64xf32>
    %34 = vector.multi_reduction <add>, %33, %cst [0] : vector<8x32x64xf32> to vector<32x64xf32>
    %35 = arith.addf %32, %34 : vector<32x64xf32>
    %c0_18 = arith.constant 0 : index
    %c0_19 = arith.constant 0 : index
    %36 = vector.load %arg4[%c0_18, %c0_19] : memref<32x64xf32, #tpu.memory_space<vmem>>, vector<32x64xf32>
    tpu.vector_store %arg4[%c0_18, %c0_19], %35 {strides = array<i32>} : memref<32x64xf32, #tpu.memory_space<vmem>>, vector<32x64xf32>,
    return
  }
  func.func @transform_0(%arg0: i32, %arg1: i32) -> (i32, i32, i32) {
    %c0_i32 = arith.constant 0 : i32
    %c0_i32_0 = arith.constant 0 : i32
    %c0_i32_1 = arith.constant 0 : i32
    return %c0_i32, %arg0, %c0_i32_0 : i32, i32, i32
  }
  func.func @transform_1(%arg0: i32, %arg1: i32) -> (i32, i32, i32) {
    %c0_i32 = arith.constant 0 : i32
    %c0_i32_0 = arith.constant 0 : i32
    %c0_i32_1 = arith.constant 0 : i32
    return %c0_i32, %arg1, %c0_i32_0 : i32, i32, i32
  }
  func.func @transform_2(%arg0: i32, %arg1: i32) -> (i32, i32) {
    %c0_i32 = arith.constant 0 : i32
    %c0_i32_0 = arith.constant 0 : i32
    return %arg0, %c0_i32 : i32, i32
  }
}

</mosaic_0001>

<bundles_post_ra>
// kernel: squeeze.1
= control target key start
LH: loop header
LB: loop body
LE: loop exit
PB: predicated region body
PF: predicated region fallthrough
CT: control target
= control target key end

     0   :  { %2 = vsyncpa [#allocation1], 0  ;;  %s2101_s8 = smov [#allocation0]   ;;  %s4103_s0 = inlined_call_operand.hbm [shape: f32[1,3,64,64], index: 0, kind: input, shape index: {}]   ;;  %s4104_s1 = inlined_call_operand.vmem [shape: f32[3,8,8,8,8], index: 1, kind: output, shape index: {}]  }
   0x1   :  { %s6_s0 = sshll.u32 %s4103_s0, 4  ;;  %s8_s9 = sshll.u32 %s2101_s8, 4  ;;  %s7_s0 = int_to_ptr.hbm [resolvable:$true] %s6_s0  ;;  %s9_s9 = int_to_ptr.vmem [resolvable:$true] %s8_s9 }
   0x2   :  { %11 = dma.hbm_to_vmem [thread:$0]  %s7_s0, 3072, %s9_s9, [#allocation1]  }
   0x3   :  { %2099 = dma.done.wait [#allocation1], 3072  }
   0x4   :  { %2100 = vsyncadd [#allocation1], 4294964224  ;;  %v2122_v0 = vld [vmem:[#allocation0 + $0x10] sm:$0xff]   ;;  %v2124_v1 = vld [vmem:[#allocation0] sm:$0xff]   ;;  %s2102_s10 = smov 120   ;;  %s2103_s11 = smov 112  }
   0x5   :  { %198 = vrot.lane.b32.xlu1 %v2122_v0, %s2102_s10  ;;  %180 = vrot.lane.b32.xlu0 %v2124_v1, %s2102_s10  ;;  %v2130_v2 = vld [vmem:[#allocation0 + $0x20] sm:$0xff]   ;;  %v2134_v3 = vld [vmem:[#allocation0 + $0x18] sm:$0xff]   ;;  %v2136_v4 = vld [vmem:[#allocation0 + $0x8] sm:$0xff]   ;;  %vm15_vm0 = vcmask 64512   ;;  %s2104_s16 = smov 104   ;;  %s2105_s25 = smov 96  }
   0x6   :  { %216 = vrot.lane.b32.xlu2 %v2130_v2, %s2102_s10  ;;  %v2138_v5 = vld [vmem:[#allocation0 + $0x28] sm:$0xff]   ;;  %v2146_v6 = vld [vmem:[#allocation0 + $0x38] sm:$0xff]   ;;  %v2148_v7 = vld [vmem:[#allocation0 + $0x30] sm:$0xff]   ;;  %s2106_s5 = smov 88   ;;  %s2107_s17 = smov 80  }
   0x7   :  { %v2150_v8 = vld [vmem:[#allocation0 + $0x40] sm:$0xff]   ;;  %v2158_v9 = vld [vmem:[#allocation0 + $0x50] sm:$0xff]   ;;  %v2160_v10 = vld [vmem:[#allocation0 + $0x48] sm:$0xff]   ;;  %s2108_s29 = smov 72  }
   0x8   :  { %v2162_v11 = vld [vmem:[#allocation0 + $0x58] sm:$0xff]   ;;  %v2170_v12 = vld [vmem:[#allocation0 + $0x68] sm:$0xff]   ;;  %v2172_v13 = vld [vmem:[#allocation0 + $0x60] sm:$0xff]  }
   0x9   :  { %v2174_v14 = vld [vmem:[#allocation0 + $0x70] sm:$0xff]   ;;  %v2182_v15 = vld [vmem:[#allocation0 + $0x80] sm:$0xff]   ;;  %v2184_v16 = vld [vmem:[#allocation0 + $0x78] sm:$0xff]  }
   0xa   :  { %v2186_v17 = vld [vmem:[#allocation0 + $0x88] sm:$0xff]   ;;  %v2194_v18 = vld [vmem:[#allocation0 + $0x98] sm:$0xff]   ;;  %v2196_v19 = vld [vmem:[#allocation0 + $0x90] sm:$0xff]  }
   0xb   :  { %v2198_v20 = vld [vmem:[#allocation0 + $0xa0] sm:$0xff]   ;;  %v2206_v21 = vld [vmem:[#allocation0 + $0xb0] sm:$0xff]   ;;  %v2208_v22 = vld [vmem:[#allocation0 + $0xa8] sm:$0xff]  }
   0xc   :  { %v2210_v23 = vld [vmem:[#allocation0 + $0xb8] sm:$0xff]  }
   0xd   :  { %207 = vrot.lane.b32.xlu1 %v2134_v3, %s2102_s10  ;;  %189 = vrot.lane.b32.xlu0 %v2136_v4, %s2102_s10 }
   0xe   :  { %225 = vrot.lane.b32.xlu2 %v2138_v5, %s2102_s10 }
  0x15   :  { %243 = vrot.lane.b32.xlu1 %v2146_v6, %s2102_s10  ;;  %234 = vrot.lane.b32.xlu0 %v2148_v7, %s2102_s10 }
  0x16   :  { %252 = vrot.lane.b32.xlu2 %v2150_v8, %s2102_s10 }
  0x1d   :  { %270 = vrot.lane.b32.xlu1 %v2158_v9, %s2102_s10  ;;  %261 = vrot.lane.b32.xlu0 %v2160_v10, %s2102_s10 }
  0x1e   :  { %279 = vrot.lane.b32.xlu2 %v2162_v11, %s2102_s10 }
  0x25   :  { %297 = vrot.lane.b32.xlu1 %v2170_v12, %s2102_s10  ;;  %288 = vrot.lane.b32.xlu0 %v2172_v13, %s2102_s10 }
  0x26   :  { %306 = vrot.lane.b32.xlu2 %v2174_v14, %s2102_s10 }
  0x2d   :  { %324 = vrot.lane.b32.xlu1 %v2182_v15, %s2102_s10  ;;  %315 = vrot.lane.b32.xlu0 %v2184_v16, %s2102_s10 }
  0x2e   :  { %333 = vrot.lane.b32.xlu2 %v2186_v17, %s2102_s10 }
  0x35   :  { %351 = vrot.lane.b32.xlu1 %v2194_v18, %s2102_s10  ;;  %342 = vrot.lane.b32.xlu0 %v2196_v19, %s2102_s10 }
  0x36   :  { %360 = vrot.lane.b32.xlu2 %v2198_v20, %s2102_s10 }
  0x3d   :  { %378 = vrot.lane.b32.xlu1 %v2206_v21, %s2102_s10  ;;  %369 = vrot.lane.b32.xlu0 %v2208_v22, %s2102_s10 }
  0x3e   :  { %387 = vrot.lane.b32.xlu2 %v2210_v23, %s2102_s10 }
  0x45   :  { %404 = vrot.lane.b32.xlu1 %v2136_v4, %s2103_s11  ;;  %395 = vrot.lane.b32.xlu0 %v2124_v1, %s2103_s11 }
  0x46   :  { %413 = vrot.lane.b32.xlu2 %v2122_v0, %s2103_s11 }
  0x4d   :  { %431 = vrot.lane.b32.xlu1 %v2130_v2, %s2103_s11  ;;  %422 = vrot.lane.b32.xlu0 %v2134_v3, %s2103_s11 }
  0x4e   :  { %440 = vrot.lane.b32.xlu2 %v2138_v5, %s2103_s11 }
  0x55   :  { %458 = vrot.lane.b32.xlu1 %v2146_v6, %s2103_s11  ;;  %449 = vrot.lane.b32.xlu0 %v2148_v7, %s2103_s11 }
  0x56   :  { %467 = vrot.lane.b32.xlu2 %v2150_v8, %s2103_s11 }
  0x5d   :  { %485 = vrot.lane.b32.xlu1 %v2158_v9, %s2103_s11  ;;  %476 = vrot.lane.b32.xlu0 %v2160_v10, %s2103_s11 }
  0x5e   :  { %494 = vrot.lane.b32.xlu2 %v2162_v11, %s2103_s11 }
  0x60   :  { %v217_v24 = vpop.permute.xlu2 %216  }
  0x61   :  { %1739 = vst.msk [vmem:[%s4104_s1 + $0x101] ss:$8 sm:$0xf] %vm15_vm0, %v217_v24  }
  0x62   :  { %1740 = vst.msk [vmem:[%s4104_s1 + $0x101] ss:$8 sm:$0xf0] %vm15_vm0, %v217_v24  }
  0x65   :  { %512 = vrot.lane.b32.xlu1 %v2170_v12, %s2103_s11  ;;  %503 = vrot.lane.b32.xlu0 %v2172_v13, %s2103_s11 }
  0x66   :  { %521 = vrot.lane.b32.xlu2 %v2174_v14, %s2103_s11 }
  0x68   :  { %v226_v25 = vpop.permute.xlu2 %225  }
  0x69   :  { %1741 = vst.msk [vmem:[%s4104_s1 + $0x141] ss:$8 sm:$0xf] %vm15_vm0, %v226_v25  }
  0x6a   :  { %1742 = vst.msk [vmem:[%s4104_s1 + $0x141] ss:$8 sm:$0xf0] %vm15_vm0, %v226_v25  }
  0x6d   :  { %539 = vrot.lane.b32.xlu1 %v2182_v15, %s2103_s11  ;;  %530 = vrot.lane.b32.xlu0 %v2184_v16, %s2103_s11 }
  0x6e   :  { %548 = vrot.lane.b32.xlu2 %v2186_v17, %s2103_s11 }
  0x70   :  { %v253_v26 = vpop.permute.xlu2 %252  }
  0x71   :  { %1747 = vst.msk [vmem:[%s4104_s1 + $0x201] ss:$8 sm:$0xf] %vm15_vm0, %v253_v26  }
  0x72   :  { %1748 = vst.msk [vmem:[%s4104_s1 + $0x201] ss:$8 sm:$0xf0] %vm15_vm0, %v253_v26  }
  0x75   :  { %566 = vrot.lane.b32.xlu1 %v2194_v18, %s2103_s11  ;;  %557 = vrot.lane.b32.xlu0 %v2196_v19, %s2103_s11 }
  0x76   :  { %575 = vrot.lane.b32.xlu2 %v2198_v20, %s2103_s11 }
  0x77   :  { %v199_v27 = vpop.permute.xlu1 %198   ;;  %v181_v28 = vpop.permute.xlu0 %180  }
  0x78   :  { %1735 = vst.msk [vmem:[%s4104_s1 + $0x81] ss:$8 sm:$0xf] %vm15_vm0, %v199_v27   ;;  %v280_v29 = vpop.permute.xlu2 %279  }
  0x79   :  { %1736 = vst.msk [vmem:[%s4104_s1 + $0x81] ss:$8 sm:$0xf0] %vm15_vm0, %v199_v27  }
  0x7a   :  { %1731 = vst.msk [vmem:[%s4104_s1 + $0x1] ss:$8 sm:$0xf] %vm15_vm0, %v181_v28  }
  0x7b   :  { %1732 = vst.msk [vmem:[%s4104_s1 + $0x1] ss:$8 sm:$0xf0] %vm15_vm0, %v181_v28  }
  0x7c   :  { %1753 = vst.msk [vmem:[%s4104_s1 + $0x2c1] ss:$8 sm:$0xf] %vm15_vm0, %v280_v29  }
  0x7d   :  { %593 = vrot.lane.b32.xlu1 %v2206_v21, %s2103_s11  ;;  %584 = vrot.lane.b32.xlu0 %v2208_v22, %s2103_s11  ;;  %1754 = vst.msk [vmem:[%s4104_s1 + $0x2c1] ss:$8 sm:$0xf0] %vm15_vm0, %v280_v29  }
  0x7e   :  { %602 = vrot.lane.b32.xlu2 %v2210_v23, %s2103_s11 }
  0x7f   :  { %v208_v30 = vpop.permute.xlu1 %207   ;;  %v190_v31 = vpop.permute.xlu0 %189  }
  0x80   :  { %1737 = vst.msk [vmem:[%s4104_s1 + $0xc1] ss:$8 sm:$0xf] %vm15_vm0, %v208_v30   ;;  %v307_v32 = vpop.permute.xlu2 %306  }
  0x81   :  { %1738 = vst.msk [vmem:[%s4104_s1 + $0xc1] ss:$8 sm:$0xf0] %vm15_vm0, %v208_v30  }
  0x82   :  { %1733 = vst.msk [vmem:[%s4104_s1 + $0x41] ss:$8 sm:$0xf] %vm15_vm0, %v190_v31  }
  0x83   :  { %1734 = vst.msk [vmem:[%s4104_s1 + $0x41] ss:$8 sm:$0xf0] %vm15_vm0, %v190_v31  }
  0x84   :  { %1759 = vst.msk [vmem:[%s4104_s1 + $0x381] ss:$8 sm:$0xf] %vm15_vm0, %v307_v32  }
  0x85   :  { %619 = vrot.lane.b32.xlu1 %v2136_v4, %s2104_s16  ;;  %610 = vrot.lane.b32.xlu0 %v2124_v1, %s2104_s16  ;;  %1760 = vst.msk [vmem:[%s4104_s1 + $0x381] ss:$8 sm:$0xf0] %vm15_vm0, %v307_v32  }
  0x86   :  { %628 = vrot.lane.b32.xlu2 %v2122_v0, %s2104_s16 }
  0x87   :  { %v244_v33 = vpop.permute.xlu1 %243   ;;  %v235_v34 = vpop.permute.xlu0 %234  }
  0x88   :  { %1745 = vst.msk [vmem:[%s4104_s1 + $0x1c1] ss:$8 sm:$0xf] %vm15_vm0, %v244_v33   ;;  %v334_v35 = vpop.permute.xlu2 %333  }
  0x89   :  { %1746 = vst.msk [vmem:[%s4104_s1 + $0x1c1] ss:$8 sm:$0xf0] %vm15_vm0, %v244_v33  }
  0x8a   :  { %1743 = vst.msk [vmem:[%s4104_s1 + $0x181] ss:$8 sm:$0xf] %vm15_vm0, %v235_v34  }
  0x8b   :  { %1744 = vst.msk [vmem:[%s4104_s1 + $0x181] ss:$8 sm:$0xf0] %vm15_vm0, %v235_v34  }
  0x8c   :  { %1765 = vst.msk [vmem:[%s4104_s1 + $0x441] ss:$8 sm:$0xf] %vm15_vm0, %v334_v35  }
  0x8d   :  { %646 = vrot.lane.b32.xlu1 %v2130_v2, %s2104_s16  ;;  %637 = vrot.lane.b32.xlu0 %v2134_v3, %s2104_s16  ;;  %1766 = vst.msk [vmem:[%s4104_s1 + $0x441] ss:$8 sm:$0xf0] %vm15_vm0, %v334_v35  }
  0x8e   :  { %655 = vrot.lane.b32.xlu2 %v2138_v5, %s2104_s16 }
  0x8f   :  { %v271_v36 = vpop.permute.xlu1 %270   ;;  %v262_v37 = vpop.permute.xlu0 %261  }
  0x90   :  { %1751 = vst.msk [vmem:[%s4104_s1 + $0x281] ss:$8 sm:$0xf] %vm15_vm0, %v271_v36   ;;  %v361_v38 = vpop.permute.xlu2 %360  }
  0x91   :  { %1752 = vst.msk [vmem:[%s4104_s1 + $0x281] ss:$8 sm:$0xf0] %vm15_vm0, %v271_v36  }
  0x92   :  { %1749 = vst.msk [vmem:[%s4104_s1 + $0x241] ss:$8 sm:$0xf] %vm15_vm0, %v262_v37  }
  0x93   :  { %1750 = vst.msk [vmem:[%s4104_s1 + $0x241] ss:$8 sm:$0xf0] %vm15_vm0, %v262_v37  }
  0x94   :  { %1771 = vst.msk [vmem:[%s4104_s1 + $0x501] ss:$8 sm:$0xf] %vm15_vm0, %v361_v38  }
  0x95   :  { %673 = vrot.lane.b32.xlu1 %v2146_v6, %s2104_s16  ;;  %664 = vrot.lane.b32.xlu0 %v2148_v7, %s2104_s16  ;;  %1772 = vst.msk [vmem:[%s4104_s1 + $0x501] ss:$8 sm:$0xf0] %vm15_vm0, %v361_v38  }
  0x96   :  { %682 = vrot.lane.b32.xlu2 %v2150_v8, %s2104_s16 }
  0x97   :  { %v298_v39 = vpop.permute.xlu1 %297   ;;  %v289_v40 = vpop.permute.xlu0 %288  }
  0x98   :  { %1757 = vst.msk [vmem:[%s4104_s1 + $0x341] ss:$8 sm:$0xf] %vm15_vm0, %v298_v39   ;;  %v388_v41 = vpop.permute.xlu2 %387  }
  0x99   :  { %1758 = vst.msk [vmem:[%s4104_s1 + $0x341] ss:$8 sm:$0xf0] %vm15_vm0, %v298_v39  }
  0x9a   :  { %1755 = vst.msk [vmem:[%s4104_s1 + $0x301] ss:$8 sm:$0xf] %vm15_vm0, %v289_v40  }
  0x9b   :  { %1756 = vst.msk [vmem:[%s4104_s1 + $0x301] ss:$8 sm:$0xf0] %vm15_vm0, %v289_v40  }
  0x9c   :  { %1777 = vst.msk [vmem:[%s4104_s1 + $0x5c1] ss:$8 sm:$0xf] %vm15_vm0, %v388_v41  }
  0x9d   :  { %700 = vrot.lane.b32.xlu1 %v2158_v9, %s2104_s16  ;;  %691 = vrot.lane.b32.xlu0 %v2160_v10, %s2104_s16  ;;  %1778 = vst.msk [vmem:[%s4104_s1 + $0x5c1] ss:$8 sm:$0xf0] %vm15_vm0, %v388_v41  }
  0x9e   :  { %709 = vrot.lane.b32.xlu2 %v2162_v11, %s2104_s16 }
  0x9f   :  { %v325_v42 = vpop.permute.xlu1 %324   ;;  %v316_v43 = vpop.permute.xlu0 %315  }
  0xa0   :  { %1763 = vst.msk [vmem:[%s4104_s1 + $0x401] ss:$8 sm:$0xf] %vm15_vm0, %v325_v42   ;;  %v414_v44 = vpop.permute.xlu2 %413  }
  0xa1   :  { %1764 = vst.msk [vmem:[%s4104_s1 + $0x401] ss:$8 sm:$0xf0] %vm15_vm0, %v325_v42  }
  0xa2   :  { %1761 = vst.msk [vmem:[%s4104_s1 + $0x3c1] ss:$8 sm:$0xf] %vm15_vm0, %v316_v43  }
  0xa3   :  { %1762 = vst.msk [vmem:[%s4104_s1 + $0x3c1] ss:$8 sm:$0xf0] %vm15_vm0, %v316_v43  }
  0xa4   :  { %1783 = vst.msk [vmem:[%s4104_s1 + $0x82] ss:$8 sm:$0xf] %vm15_vm0, %v414_v44  }
  0xa5   :  { %727 = vrot.lane.b32.xlu1 %v2170_v12, %s2104_s16  ;;  %718 = vrot.lane.b32.xlu0 %v2172_v13, %s2104_s16  ;;  %1784 = vst.msk [vmem:[%s4104_s1 + $0x82] ss:$8 sm:$0xf0] %vm15_vm0, %v414_v44  }
  0xa6   :  { %736 = vrot.lane.b32.xlu2 %v2174_v14, %s2104_s16 }
  0xa7   :  { %v352_v45 = vpop.permute.xlu1 %351   ;;  %v343_v46 = vpop.permute.xlu0 %342  }
  0xa8   :  { %1769 = vst.msk [vmem:[%s4104_s1 + $0x4c1] ss:$8 sm:$0xf] %vm15_vm0, %v352_v45   ;;  %v441_v47 = vpop.permute.xlu2 %440  }
  0xa9   :  { %1770 = vst.msk [vmem:[%s4104_s1 + $0x4c1] ss:$8 sm:$0xf0] %vm15_vm0, %v352_v45  }
  0xaa   :  { %1767 = vst.msk [vmem:[%s4104_s1 + $0x481] ss:$8 sm:$0xf] %vm15_vm0, %v343_v46  }
  0xab   :  { %1768 = vst.msk [vmem:[%s4104_s1 + $0x481] ss:$8 sm:$0xf0] %vm15_vm0, %v343_v46  }
  0xac   :  { %1789 = vst.msk [vmem:[%s4104_s1 + $0x142] ss:$8 sm:$0xf] %vm15_vm0, %v441_v47  }
  0xad   :  { %754 = vrot.lane.b32.xlu1 %v2182_v15, %s2104_s16  ;;  %745 = vrot.lane.b32.xlu0 %v2184_v16, %s2104_s16  ;;  %1790 = vst.msk [vmem:[%s4104_s1 + $0x142] ss:$8 sm:$0xf0] %vm15_vm0, %v441_v47  }
  0xae   :  { %763 = vrot.lane.b32.xlu2 %v2186_v17, %s2104_s16 }
  0xaf   :  { %v379_v48 = vpop.permute.xlu1 %378   ;;  %v370_v49 = vpop.permute.xlu0 %369  }
  0xb0   :  { %1775 = vst.msk [vmem:[%s4104_s1 + $0x581] ss:$8 sm:$0xf] %vm15_vm0, %v379_v48   ;;  %v468_v50 = vpop.permute.xlu2 %467  }
  0xb1   :  { %1776 = vst.msk [vmem:[%s4104_s1 + $0x581] ss:$8 sm:$0xf0] %vm15_vm0, %v379_v48  }
  0xb2   :  { %1773 = vst.msk [vmem:[%s4104_s1 + $0x541] ss:$8 sm:$0xf] %vm15_vm0, %v370_v49  }
  0xb3   :  { %1774 = vst.msk [vmem:[%s4104_s1 + $0x541] ss:$8 sm:$0xf0] %vm15_vm0, %v370_v49  }
  0xb4   :  { %1795 = vst.msk [vmem:[%s4104_s1 + $0x202] ss:$8 sm:$0xf] %vm15_vm0, %v468_v50  }
  0xb5   :  { %781 = vrot.lane.b32.xlu1 %v2194_v18, %s2104_s16  ;;  %772 = vrot.lane.b32.xlu0 %v2196_v19, %s2104_s16  ;;  %1796 = vst.msk [vmem:[%s4104_s1 + $0x202] ss:$8 sm:$0xf0] %vm15_vm0, %v468_v50  }
  0xb6   :  { %790 = vrot.lane.b32.xlu2 %v2198_v20, %s2104_s16 }
  0xb7   :  { %v405_v51 = vpop.permute.xlu1 %404   ;;  %v396_v52 = vpop.permute.xlu0 %395  }
  0xb8   :  { %1781 = vst.msk [vmem:[%s4104_s1 + $0x42] ss:$8 sm:$0xf] %vm15_vm0, %v405_v51   ;;  %v495_v53 = vpop.permute.xlu2 %494  }
  0xb9   :  { %1782 = vst.msk [vmem:[%s4104_s1 + $0x42] ss:$8 sm:$0xf0] %vm15_vm0, %v405_v51  }
  0xba   :  { %1779 = vst.msk [vmem:[%s4104_s1 + $0x2] ss:$8 sm:$0xf] %vm15_vm0, %v396_v52  }
  0xbb   :  { %1780 = vst.msk [vmem:[%s4104_s1 + $0x2] ss:$8 sm:$0xf0] %vm15_vm0, %v396_v52  }
  0xbc   :  { %1801 = vst.msk [vmem:[%s4104_s1 + $0x2c2] ss:$8 sm:$0xf] %vm15_vm0, %v495_v53  }
  0xbd   :  { %808 = vrot.lane.b32.xlu1 %v2206_v21, %s2104_s16  ;;  %799 = vrot.lane.b32.xlu0 %v2208_v22, %s2104_s16  ;;  %1802 = vst.msk [vmem:[%s4104_s1 + $0x2c2] ss:$8 sm:$0xf0] %vm15_vm0, %v495_v53  }
  0xbe   :  { %817 = vrot.lane.b32.xlu2 %v2210_v23, %s2104_s16 }
  0xbf   :  { %v432_v54 = vpop.permute.xlu1 %431   ;;  %v423_v55 = vpop.permute.xlu0 %422  }
  0xc0   :  { %1787 = vst.msk [vmem:[%s4104_s1 + $0x102] ss:$8 sm:$0xf] %vm15_vm0, %v432_v54   ;;  %v522_v56 = vpop.permute.xlu2 %521  }
  0xc1   :  { %1788 = vst.msk [vmem:[%s4104_s1 + $0x102] ss:$8 sm:$0xf0] %vm15_vm0, %v432_v54  }
  0xc2   :  { %1785 = vst.msk [vmem:[%s4104_s1 + $0xc2] ss:$8 sm:$0xf] %vm15_vm0, %v423_v55  }
  0xc3   :  { %1786 = vst.msk [vmem:[%s4104_s1 + $0xc2] ss:$8 sm:$0xf0] %vm15_vm0, %v423_v55  }
  0xc4   :  { %1807 = vst.msk [vmem:[%s4104_s1 + $0x382] ss:$8 sm:$0xf] %vm15_vm0, %v522_v56  }
  0xc5   :  { %834 = vrot.lane.b32.xlu1 %v2136_v4, %s2105_s25  ;;  %825 = vrot.lane.b32.xlu0 %v2124_v1, %s2105_s25  ;;  %1808 = vst.msk [vmem:[%s4104_s1 + $0x382] ss:$8 sm:$0xf0] %vm15_vm0, %v522_v56  }
  0xc6   :  { %843 = vrot.lane.b32.xlu2 %v2122_v0, %s2105_s25 }
  0xc7   :  { %v459_v57 = vpop.permute.xlu1 %458   ;;  %v450_v58 = vpop.permute.xlu0 %449  }
  0xc8   :  { %1793 = vst.msk [vmem:[%s4104_s1 + $0x1c2] ss:$8 sm:$0xf] %vm15_vm0, %v459_v57   ;;  %v549_v59 = vpop.permute.xlu2 %548  }
  0xc9   :  { %1794 = vst.msk [vmem:[%s4104_s1 + $0x1c2] ss:$8 sm:$0xf0] %vm15_vm0, %v459_v57  }
  0xca   :  { %1791 = vst.msk [vmem:[%s4104_s1 + $0x182] ss:$8 sm:$0xf] %vm15_vm0, %v450_v58  }
  0xcb   :  { %1792 = vst.msk [vmem:[%s4104_s1 + $0x182] ss:$8 sm:$0xf0] %vm15_vm0, %v450_v58   ;;  %v3226_v58 = vld [vmem:[#allocation0 + $0x68] sm:$0xff]  }
  0xcc   :  { %1813 = vst.msk [vmem:[%s4104_s1 + $0x442] ss:$8 sm:$0xf] %vm15_vm0, %v549_v59  }
  0xcd   :  { %861 = vrot.lane.b32.xlu1 %v2130_v2, %s2105_s25  ;;  %852 = vrot.lane.b32.xlu0 %v2134_v3, %s2105_s25  ;;  %1814 = vst.msk [vmem:[%s4104_s1 + $0x442] ss:$8 sm:$0xf0] %vm15_vm0, %v549_v59   ;;  %v3236_v59 = vld [vmem:[#allocation0 + $0x70] sm:$0xff]  }
  0xce   :  { %870 = vrot.lane.b32.xlu2 %v2138_v5, %s2105_s25  ;;  %1709 = vst.msk [vmem:[%s4104_s1 + $0x340] ss:$8 sm:$0xf] %vm15_vm0, %v3226_v58  }
  0xcf   :  { %v486_v60 = vpop.permute.xlu1 %485   ;;  %v477_v61 = vpop.permute.xlu0 %476   ;;  %1710 = vst.msk [vmem:[%s4104_s1 + $0x340] ss:$8 sm:$0xf0] %vm15_vm0, %v3226_v58  }
  0xd0   :  { %1799 = vst.msk [vmem:[%s4104_s1 + $0x282] ss:$8 sm:$0xf] %vm15_vm0, %v486_v60   ;;  %v576_v62 = vpop.permute.xlu2 %575  }
  0xd1   :  { %1800 = vst.msk [vmem:[%s4104_s1 + $0x282] ss:$8 sm:$0xf0] %vm15_vm0, %v486_v60   ;;  %v3246_v60 = vld [vmem:[#allocation0] sm:$0xff]  }
  0xd2   :  { %1797 = vst.msk [vmem:[%s4104_s1 + $0x242] ss:$8 sm:$0xf] %vm15_vm0, %v477_v61  }
  0xd3   :  { %1798 = vst.msk [vmem:[%s4104_s1 + $0x242] ss:$8 sm:$0xf0] %vm15_vm0, %v477_v61  }
  0xd4   :  { %1819 = vst.msk [vmem:[%s4104_s1 + $0x502] ss:$8 sm:$0xf] %vm15_vm0, %v576_v62  }
  0xd5   :  { %888 = vrot.lane.b32.xlu1 %v2146_v6, %s2105_s25  ;;  %879 = vrot.lane.b32.xlu0 %v2148_v7, %s2105_s25  ;;  %1820 = vst.msk [vmem:[%s4104_s1 + $0x502] ss:$8 sm:$0xf0] %vm15_vm0, %v576_v62  }
  0xd6   :  { %897 = vrot.lane.b32.xlu2 %v2150_v8, %s2105_s25  ;;  %16 = vst.msk [vmem:[%s4104_s1] ss:$8 sm:$0xf] %vm15_vm0, %v3246_v60  }
  0xd7   :  { %v513_v63 = vpop.permute.xlu1 %512   ;;  %v504_v24 = vpop.permute.xlu0 %503   ;;  %17 = vst.msk [vmem:[%s4104_s1] ss:$8 sm:$0xf0] %vm15_vm0, %v3246_v60  }
  0xd8   :  { %1805 = vst.msk [vmem:[%s4104_s1 + $0x342] ss:$8 sm:$0xf] %vm15_vm0, %v513_v63   ;;  %v603_v25 = vpop.permute.xlu2 %602  }
  0xd9   :  { %1806 = vst.msk [vmem:[%s4104_s1 + $0x342] ss:$8 sm:$0xf0] %vm15_vm0, %v513_v63  }
  0xda   :  { %1803 = vst.msk [vmem:[%s4104_s1 + $0x302] ss:$8 sm:$0xf] %vm15_vm0, %v504_v24  }
  0xdb   :  { %1804 = vst.msk [vmem:[%s4104_s1 + $0x302] ss:$8 sm:$0xf0] %vm15_vm0, %v504_v24   ;;  %v3272_v24 = vld [vmem:[#allocation0 + $0x80] sm:$0xff]  }
  0xdc   :  { %1825 = vst.msk [vmem:[%s4104_s1 + $0x5c2] ss:$8 sm:$0xf] %vm15_vm0, %v603_v25  }
  0xdd   :  { %915 = vrot.lane.b32.xlu1 %v2158_v9, %s2105_s25  ;;  %906 = vrot.lane.b32.xlu0 %v2160_v10, %s2105_s25  ;;  %1826 = vst.msk [vmem:[%s4104_s1 + $0x5c2] ss:$8 sm:$0xf0] %vm15_vm0, %v603_v25   ;;  %v3274_v25 = vld [vmem:[#allocation0 + $0x78] sm:$0xff]  }
  0xde   :  { %924 = vrot.lane.b32.xlu2 %v2162_v11, %s2105_s25  ;;  %1711 = vst.msk [vmem:[%s4104_s1 + $0x380] ss:$8 sm:$0xf] %vm15_vm0, %v3236_v59  }
  0xdf   :  { %v540_v26 = vpop.permute.xlu1 %539   ;;  %v531_v27 = vpop.permute.xlu0 %530   ;;  %1712 = vst.msk [vmem:[%s4104_s1 + $0x380] ss:$8 sm:$0xf0] %vm15_vm0, %v3236_v59  }
  0xe0   :  { %1811 = vst.msk [vmem:[%s4104_s1 + $0x402] ss:$8 sm:$0xf] %vm15_vm0, %v540_v26   ;;  %v629_v28 = vpop.permute.xlu2 %628  }
  0xe1   :  { %1812 = vst.msk [vmem:[%s4104_s1 + $0x402] ss:$8 sm:$0xf0] %vm15_vm0, %v540_v26   ;;  %v3284_v26 = vld [vmem:[#allocation0 + $0x88] sm:$0xff]  }
  0xe2   :  { %1809 = vst.msk [vmem:[%s4104_s1 + $0x3c2] ss:$8 sm:$0xf] %vm15_vm0, %v531_v27  }
  0xe3   :  { %1810 = vst.msk [vmem:[%s4104_s1 + $0x3c2] ss:$8 sm:$0xf0] %vm15_vm0, %v531_v27   ;;  %v1478_v27 = vld [vmem:[#allocation0 + $0x8] sm:$0xff]  }
  0xe4   :  { %1831 = vst.msk [vmem:[%s4104_s1 + $0x83] ss:$8 sm:$0xf] %vm15_vm0, %v629_v28  }
  0xe5   :  { %942 = vrot.lane.b32.xlu1 %v2170_v12, %s2105_s25  ;;  %933 = vrot.lane.b32.xlu0 %v2172_v13, %s2105_s25  ;;  %1832 = vst.msk [vmem:[%s4104_s1 + $0x83] ss:$8 sm:$0xf0] %vm15_vm0, %v629_v28  }
  0xe6   :  { %951 = vrot.lane.b32.xlu2 %v2174_v14, %s2105_s25  ;;  %1685 = vst.msk [vmem:[%s4104_s1 + $0x40] ss:$8 sm:$0xf] %vm15_vm0, %v1478_v27  }
  0xe7   :  { %v567_v29 = vpop.permute.xlu1 %566   ;;  %v558_v30 = vpop.permute.xlu0 %557   ;;  %1686 = vst.msk [vmem:[%s4104_s1 + $0x40] ss:$8 sm:$0xf0] %vm15_vm0, %v1478_v27  }
  0xe8   :  { %1817 = vst.msk [vmem:[%s4104_s1 + $0x4c2] ss:$8 sm:$0xf] %vm15_vm0, %v567_v29   ;;  %v656_v31 = vpop.permute.xlu2 %655  }
  0xe9   :  { %1818 = vst.msk [vmem:[%s4104_s1 + $0x4c2] ss:$8 sm:$0xf0] %vm15_vm0, %v567_v29  }
  0xea   :  { %1815 = vst.msk [vmem:[%s4104_s1 + $0x482] ss:$8 sm:$0xf] %vm15_vm0, %v558_v30  }
  0xeb   :  { %1816 = vst.msk [vmem:[%s4104_s1 + $0x482] ss:$8 sm:$0xf0] %vm15_vm0, %v558_v30  }
  0xec   :  { %1837 = vst.msk [vmem:[%s4104_s1 + $0x143] ss:$8 sm:$0xf] %vm15_vm0, %v656_v31  }
  0xed   :  { %969 = vrot.lane.b32.xlu1 %v2182_v15, %s2105_s25  ;;  %960 = vrot.lane.b32.xlu0 %v2184_v16, %s2105_s25  ;;  %1838 = vst.msk [vmem:[%s4104_s1 + $0x143] ss:$8 sm:$0xf0] %vm15_vm0, %v656_v31   ;;  %v3316_v31 = vld [vmem:[#allocation0 + $0x98] sm:$0xff]  }
  0xee   :  { %978 = vrot.lane.b32.xlu2 %v2186_v17, %s2105_s25  ;;  %1713 = vst.msk [vmem:[%s4104_s1 + $0x3c0] ss:$8 sm:$0xf] %vm15_vm0, %v3274_v25  }
  0xef   :  { %v594_v32 = vpop.permute.xlu1 %593   ;;  %v585_v33 = vpop.permute.xlu0 %584   ;;  %1714 = vst.msk [vmem:[%s4104_s1 + $0x3c0] ss:$8 sm:$0xf0] %vm15_vm0, %v3274_v25  }
  0xf0   :  { %1823 = vst.msk [vmem:[%s4104_s1 + $0x582] ss:$8 sm:$0xf] %vm15_vm0, %v594_v32   ;;  %v683_v34 = vpop.permute.xlu2 %682  }
  0xf1   :  { %1824 = vst.msk [vmem:[%s4104_s1 + $0x582] ss:$8 sm:$0xf0] %vm15_vm0, %v594_v32   ;;  %v3318_v32 = vld [vmem:[#allocation0 + $0x90] sm:$0xff]  }
  0xf2   :  { %1821 = vst.msk [vmem:[%s4104_s1 + $0x542] ss:$8 sm:$0xf] %vm15_vm0, %v585_v33  }
  0xf3   :  { %1822 = vst.msk [vmem:[%s4104_s1 + $0x542] ss:$8 sm:$0xf0] %vm15_vm0, %v585_v33   ;;  %v3328_v33 = vld [vmem:[#allocation0 + $0xa0] sm:$0xff]  }
  0xf4   :  { %1843 = vst.msk [vmem:[%s4104_s1 + $0x203] ss:$8 sm:$0xf] %vm15_vm0, %v683_v34  }
  0xf5   :  { %996 = vrot.lane.b32.xlu1 %v2194_v18, %s2105_s25  ;;  %987 = vrot.lane.b32.xlu0 %v2196_v19, %s2105_s25  ;;  %1844 = vst.msk [vmem:[%s4104_s1 + $0x203] ss:$8 sm:$0xf0] %vm15_vm0, %v683_v34   ;;  %v1496_v34 = vld [vmem:[#allocation0 + $0x18] sm:$0xff]  }
  0xf6   :  { %1005 = vrot.lane.b32.xlu2 %v2198_v20, %s2105_s25  ;;  %1689 = vst.msk [vmem:[%s4104_s1 + $0xc0] ss:$8 sm:$0xf] %vm15_vm0, %v1496_v34  }
  0xf7   :  { %v620_v35 = vpop.permute.xlu1 %619   ;;  %v611_v36 = vpop.permute.xlu0 %610   ;;  %1690 = vst.msk [vmem:[%s4104_s1 + $0xc0] ss:$8 sm:$0xf0] %vm15_vm0, %v1496_v34  }
  0xf8   :  { %1829 = vst.msk [vmem:[%s4104_s1 + $0x43] ss:$8 sm:$0xf] %vm15_vm0, %v620_v35   ;;  %v710_v37 = vpop.permute.xlu2 %709  }
  0xf9   :  { %1830 = vst.msk [vmem:[%s4104_s1 + $0x43] ss:$8 sm:$0xf0] %vm15_vm0, %v620_v35  }
  0xfa   :  { %1827 = vst.msk [vmem:[%s4104_s1 + $0x3] ss:$8 sm:$0xf] %vm15_vm0, %v611_v36  }
  0xfb   :  { %1828 = vst.msk [vmem:[%s4104_s1 + $0x3] ss:$8 sm:$0xf0] %vm15_vm0, %v611_v36  }
  0xfc   :  { %1849 = vst.msk [vmem:[%s4104_s1 + $0x2c3] ss:$8 sm:$0xf] %vm15_vm0, %v710_v37  }
  0xfd   :  { %1023 = vrot.lane.b32.xlu1 %v2206_v21, %s2105_s25  ;;  %1014 = vrot.lane.b32.xlu0 %v2208_v22, %s2105_s25  ;;  %1850 = vst.msk [vmem:[%s4104_s1 + $0x2c3] ss:$8 sm:$0xf0] %vm15_vm0, %v710_v37  }
  0xfe   :  { %1032 = vrot.lane.b32.xlu2 %v2210_v23, %s2105_s25  ;;  %1715 = vst.msk [vmem:[%s4104_s1 + $0x400] ss:$8 sm:$0xf] %vm15_vm0, %v3272_v24  }
  0xff   :  { %v647_v38 = vpop.permute.xlu1 %646   ;;  %v638_v39 = vpop.permute.xlu0 %637   ;;  %1716 = vst.msk [vmem:[%s4104_s1 + $0x400] ss:$8 sm:$0xf0] %vm15_vm0, %v3272_v24  }
 0x100   :  { %1835 = vst.msk [vmem:[%s4104_s1 + $0x103] ss:$8 sm:$0xf] %vm15_vm0, %v647_v38   ;;  %v737_v40 = vpop.permute.xlu2 %736  }
 0x101   :  { %1836 = vst.msk [vmem:[%s4104_s1 + $0x103] ss:$8 sm:$0xf0] %vm15_vm0, %v647_v38   ;;  %v3360_v38 = vld [vmem:[#allocation0 + $0xb0] sm:$0xff]  }
 0x102   :  { %1833 = vst.msk [vmem:[%s4104_s1 + $0xc3] ss:$8 sm:$0xf] %vm15_vm0, %v638_v39  }
 0x103   :  { %1834 = vst.msk [vmem:[%s4104_s1 + $0xc3] ss:$8 sm:$0xf0] %vm15_vm0, %v638_v39   ;;  %v3362_v39 = vld [vmem:[#allocation0 + $0xa8] sm:$0xff]  }
 0x104   :  { %1855 = vst.msk [vmem:[%s4104_s1 + $0x383] ss:$8 sm:$0xf] %vm15_vm0, %v737_v40  }
 0x105   :  { %1049 = vrot.lane.b32.xlu1 %v2136_v4, %s2106_s5  ;;  %1040 = vrot.lane.b32.xlu0 %v2124_v1, %s2106_s5  ;;  %1856 = vst.msk [vmem:[%s4104_s1 + $0x383] ss:$8 sm:$0xf0] %vm15_vm0, %v737_v40   ;;  %v3372_v40 = vld [vmem:[#allocation0 + $0xb8] sm:$0xff]  }
 0x106   :  { %1058 = vrot.lane.b32.xlu2 %v2122_v0, %s2106_s5  ;;  %1717 = vst.msk [vmem:[%s4104_s1 + $0x440] ss:$8 sm:$0xf] %vm15_vm0, %v3284_v26  }
 0x107   :  { %v674_v41 = vpop.permute.xlu1 %673   ;;  %v665_v42 = vpop.permute.xlu0 %664   ;;  %1718 = vst.msk [vmem:[%s4104_s1 + $0x440] ss:$8 sm:$0xf0] %vm15_vm0, %v3284_v26  }
 0x108   :  { %1841 = vst.msk [vmem:[%s4104_s1 + $0x1c3] ss:$8 sm:$0xf] %vm15_vm0, %v674_v41   ;;  %v764_v0 = vpop.permute.xlu2 %763  }
 0x109   :  { %1842 = vst.msk [vmem:[%s4104_s1 + $0x1c3] ss:$8 sm:$0xf0] %vm15_vm0, %v674_v41   ;;  %v1505_v41 = vld [vmem:[#allocation0 + $0x20] sm:$0xff]  }
 0x10a   :  { %1839 = vst.msk [vmem:[%s4104_s1 + $0x183] ss:$8 sm:$0xf] %vm15_vm0, %v665_v42  }
 0x10b   :  { %1840 = vst.msk [vmem:[%s4104_s1 + $0x183] ss:$8 sm:$0xf0] %vm15_vm0, %v665_v42  }
 0x10c   :  { %1861 = vst.msk [vmem:[%s4104_s1 + $0x443] ss:$8 sm:$0xf] %vm15_vm0, %v764_v0  }
 0x10d   :  { %1076 = vrot.lane.b32.xlu1 %v2130_v2, %s2106_s5  ;;  %1067 = vrot.lane.b32.xlu0 %v2134_v3, %s2106_s5  ;;  %1862 = vst.msk [vmem:[%s4104_s1 + $0x443] ss:$8 sm:$0xf0] %vm15_vm0, %v764_v0  }
 0x10e   :  { %1085 = vrot.lane.b32.xlu2 %v2138_v5, %s2106_s5  ;;  %1691 = vst.msk [vmem:[%s4104_s1 + $0x100] ss:$8 sm:$0xf] %vm15_vm0, %v1505_v41  }
 0x10f   :  { %v701_v43 = vpop.permute.xlu1 %700   ;;  %v692_v44 = vpop.permute.xlu0 %691   ;;  %1692 = vst.msk [vmem:[%s4104_s1 + $0x100] ss:$8 sm:$0xf0] %vm15_vm0, %v1505_v41  }
 0x110   :  { %1847 = vst.msk [vmem:[%s4104_s1 + $0x283] ss:$8 sm:$0xf] %vm15_vm0, %v701_v43   ;;  %v791_v5 = vpop.permute.xlu2 %790  }
 0x111   :  { %1848 = vst.msk [vmem:[%s4104_s1 + $0x283] ss:$8 sm:$0xf0] %vm15_vm0, %v701_v43  }
 0x112   :  { %1845 = vst.msk [vmem:[%s4104_s1 + $0x243] ss:$8 sm:$0xf] %vm15_vm0, %v692_v44  }
 0x113   :  { %1846 = vst.msk [vmem:[%s4104_s1 + $0x243] ss:$8 sm:$0xf0] %vm15_vm0, %v692_v44   ;;  %v1523_v44 = vld [vmem:[#allocation0 + $0x30] sm:$0xff]  }
 0x114   :  { %1867 = vst.msk [vmem:[%s4104_s1 + $0x503] ss:$8 sm:$0xf] %vm15_vm0, %v791_v5  }
 0x115   :  { %1103 = vrot.lane.b32.xlu1 %v2146_v6, %s2106_s5  ;;  %1094 = vrot.lane.b32.xlu0 %v2148_v7, %s2106_s5  ;;  %1868 = vst.msk [vmem:[%s4104_s1 + $0x503] ss:$8 sm:$0xf0] %vm15_vm0, %v791_v5  }
 0x116   :  { %1112 = vrot.lane.b32.xlu2 %v2150_v8, %s2106_s5  ;;  %1695 = vst.msk [vmem:[%s4104_s1 + $0x180] ss:$8 sm:$0xf] %vm15_vm0, %v1523_v44  }
 0x117   :  { %v728_v45 = vpop.permute.xlu1 %727   ;;  %v719_v46 = vpop.permute.xlu0 %718   ;;  %1696 = vst.msk [vmem:[%s4104_s1 + $0x180] ss:$8 sm:$0xf0] %vm15_vm0, %v1523_v44  }
 0x118   :  { %1853 = vst.msk [vmem:[%s4104_s1 + $0x343] ss:$8 sm:$0xf] %vm15_vm0, %v728_v45   ;;  %v818_v8 = vpop.permute.xlu2 %817  }
 0x119   :  { %1854 = vst.msk [vmem:[%s4104_s1 + $0x343] ss:$8 sm:$0xf0] %vm15_vm0, %v728_v45  }
 0x11a   :  { %1851 = vst.msk [vmem:[%s4104_s1 + $0x303] ss:$8 sm:$0xf] %vm15_vm0, %v719_v46  }
 0x11b   :  { %1852 = vst.msk [vmem:[%s4104_s1 + $0x303] ss:$8 sm:$0xf0] %vm15_vm0, %v719_v46  }
 0x11c   :  { %1873 = vst.msk [vmem:[%s4104_s1 + $0x5c3] ss:$8 sm:$0xf] %vm15_vm0, %v818_v8  }
 0x11d   :  { %1130 = vrot.lane.b32.xlu1 %v2158_v9, %s2106_s5  ;;  %1121 = vrot.lane.b32.xlu0 %v2160_v10, %s2106_s5  ;;  %1874 = vst.msk [vmem:[%s4104_s1 + $0x5c3] ss:$8 sm:$0xf0] %vm15_vm0, %v818_v8   ;;  %v1532_v8 = vld [vmem:[#allocation0 + $0x38] sm:$0xff]  }
 0x11e   :  { %1139 = vrot.lane.b32.xlu2 %v2162_v11, %s2106_s5  ;;  %1697 = vst.msk [vmem:[%s4104_s1 + $0x1c0] ss:$8 sm:$0xf] %vm15_vm0, %v1532_v8  }
 0x11f   :  { %v755_v47 = vpop.permute.xlu1 %754   ;;  %v746_v48 = vpop.permute.xlu0 %745   ;;  %1698 = vst.msk [vmem:[%s4104_s1 + $0x1c0] ss:$8 sm:$0xf0] %vm15_vm0, %v1532_v8  }
 0x120   :  { %1859 = vst.msk [vmem:[%s4104_s1 + $0x403] ss:$8 sm:$0xf] %vm15_vm0, %v755_v47   ;;  %v844_v11 = vpop.permute.xlu2 %843  }
 0x121   :  { %1860 = vst.msk [vmem:[%s4104_s1 + $0x403] ss:$8 sm:$0xf0] %vm15_vm0, %v755_v47  }
 0x122   :  { %1857 = vst.msk [vmem:[%s4104_s1 + $0x3c3] ss:$8 sm:$0xf] %vm15_vm0, %v746_v48  }
 0x123   :  { %1858 = vst.msk [vmem:[%s4104_s1 + $0x3c3] ss:$8 sm:$0xf0] %vm15_vm0, %v746_v48  }
 0x124   :  { %1879 = vst.msk [vmem:[%s4104_s1 + $0x84] ss:$8 sm:$0xf] %vm15_vm0, %v844_v11  }
 0x125   :  { %1157 = vrot.lane.b32.xlu1 %v2170_v12, %s2106_s5  ;;  %1148 = vrot.lane.b32.xlu0 %v2172_v13, %s2106_s5  ;;  %1880 = vst.msk [vmem:[%s4104_s1 + $0x84] ss:$8 sm:$0xf0] %vm15_vm0, %v844_v11  }
 0x126   :  { %1166 = vrot.lane.b32.xlu2 %v2174_v14, %s2106_s5  ;;  %1719 = vst.msk [vmem:[%s4104_s1 + $0x480] ss:$8 sm:$0xf] %vm15_vm0, %v3318_v32  }
 0x127   :  { %v782_v12 = vpop.permute.xlu1 %781   ;;  %v773_v13 = vpop.permute.xlu0 %772   ;;  %1720 = vst.msk [vmem:[%s4104_s1 + $0x480] ss:$8 sm:$0xf0] %vm15_vm0, %v3318_v32  }
 0x128   :  { %1865 = vst.msk [vmem:[%s4104_s1 + $0x4c3] ss:$8 sm:$0xf] %vm15_vm0, %v782_v12   ;;  %v871_v14 = vpop.permute.xlu2 %870  }
 0x129   :  { %1866 = vst.msk [vmem:[%s4104_s1 + $0x4c3] ss:$8 sm:$0xf0] %vm15_vm0, %v782_v12   ;;  %v1550_v12 = vld [vmem:[#allocation0 + $0x48] sm:$0xff]  }
 0x12a   :  { %1863 = vst.msk [vmem:[%s4104_s1 + $0x483] ss:$8 sm:$0xf] %vm15_vm0, %v773_v13  }
 0x12b   :  { %1864 = vst.msk [vmem:[%s4104_s1 + $0x483] ss:$8 sm:$0xf0] %vm15_vm0, %v773_v13  }
 0x12c   :  { %1885 = vst.msk [vmem:[%s4104_s1 + $0x144] ss:$8 sm:$0xf] %vm15_vm0, %v871_v14  }
 0x12d   :  { %1184 = vrot.lane.b32.xlu1 %v2182_v15, %s2106_s5  ;;  %1175 = vrot.lane.b32.xlu0 %v2184_v16, %s2106_s5  ;;  %1886 = vst.msk [vmem:[%s4104_s1 + $0x144] ss:$8 sm:$0xf0] %vm15_vm0, %v871_v14  }
 0x12e   :  { %1193 = vrot.lane.b32.xlu2 %v2186_v17, %s2106_s5  ;;  %1701 = vst.msk [vmem:[%s4104_s1 + $0x240] ss:$8 sm:$0xf] %vm15_vm0, %v1550_v12  }
 0x12f   :  { %v809_v15 = vpop.permute.xlu1 %808   ;;  %v800_v16 = vpop.permute.xlu0 %799   ;;  %1702 = vst.msk [vmem:[%s4104_s1 + $0x240] ss:$8 sm:$0xf0] %vm15_vm0, %v1550_v12  }
 0x130   :  { %1871 = vst.msk [vmem:[%s4104_s1 + $0x583] ss:$8 sm:$0xf] %vm15_vm0, %v809_v15   ;;  %v898_v17 = vpop.permute.xlu2 %897  }
 0x131   :  { %1872 = vst.msk [vmem:[%s4104_s1 + $0x583] ss:$8 sm:$0xf0] %vm15_vm0, %v809_v15  }
 0x132   :  { %1869 = vst.msk [vmem:[%s4104_s1 + $0x543] ss:$8 sm:$0xf] %vm15_vm0, %v800_v16  }
 0x133   :  { %1870 = vst.msk [vmem:[%s4104_s1 + $0x543] ss:$8 sm:$0xf0] %vm15_vm0, %v800_v16   ;;  %v1559_v16 = vld [vmem:[#allocation0 + $0x50] sm:$0xff]  }
 0x134   :  { %1891 = vst.msk [vmem:[%s4104_s1 + $0x204] ss:$8 sm:$0xf] %vm15_vm0, %v898_v17  }
 0x135   :  { %1211 = vrot.lane.b32.xlu1 %v2194_v18, %s2106_s5  ;;  %1202 = vrot.lane.b32.xlu0 %v2196_v19, %s2106_s5  ;;  %1892 = vst.msk [vmem:[%s4104_s1 + $0x204] ss:$8 sm:$0xf0] %vm15_vm0, %v898_v17  }
 0x136   :  { %1220 = vrot.lane.b32.xlu2 %v2198_v20, %s2106_s5  ;;  %1703 = vst.msk [vmem:[%s4104_s1 + $0x280] ss:$8 sm:$0xf] %vm15_vm0, %v1559_v16  }
 0x137   :  { %v835_v18 = vpop.permute.xlu1 %834   ;;  %v826_v19 = vpop.permute.xlu0 %825   ;;  %1704 = vst.msk [vmem:[%s4104_s1 + $0x280] ss:$8 sm:$0xf0] %vm15_vm0, %v1559_v16  }
 0x138   :  { %1877 = vst.msk [vmem:[%s4104_s1 + $0x44] ss:$8 sm:$0xf] %vm15_vm0, %v835_v18   ;;  %v925_v20 = vpop.permute.xlu2 %924  }
 0x139   :  { %1878 = vst.msk [vmem:[%s4104_s1 + $0x44] ss:$8 sm:$0xf0] %vm15_vm0, %v835_v18  }
 0x13a   :  { %1875 = vst.msk [vmem:[%s4104_s1 + $0x4] ss:$8 sm:$0xf] %vm15_vm0, %v826_v19  }
 0x13b   :  { %1876 = vst.msk [vmem:[%s4104_s1 + $0x4] ss:$8 sm:$0xf0] %vm15_vm0, %v826_v19  }
 0x13c   :  { %1897 = vst.msk [vmem:[%s4104_s1 + $0x2c4] ss:$8 sm:$0xf] %vm15_vm0, %v925_v20  }
 0x13d   :  { %1238 = vrot.lane.b32.xlu1 %v2206_v21, %s2106_s5  ;;  %1229 = vrot.lane.b32.xlu0 %v2208_v22, %s2106_s5  ;;  %1898 = vst.msk [vmem:[%s4104_s1 + $0x2c4] ss:$8 sm:$0xf0] %vm15_vm0, %v925_v20   ;;  %v3032_v21 = vld [vmem:[#allocation0 + $0x10] sm:$0xff]  }
 0x13e   :  { %1687 = vst.msk [vmem:[%s4104_s1 + $0x80] ss:$8 sm:$0xf] %vm15_vm0, %v3032_v21   ;;  %1247 = vrot.lane.b32.xlu2 %v2210_v23, %s2106_s5 }
 0x13f   :  { %v862_v22 = vpop.permute.xlu1 %861   ;;  %v853_v49 = vpop.permute.xlu0 %852   ;;  %1688 = vst.msk [vmem:[%s4104_s1 + $0x80] ss:$8 sm:$0xf0] %vm15_vm0, %v3032_v21  }
 0x140   :  { %1883 = vst.msk [vmem:[%s4104_s1 + $0x104] ss:$8 sm:$0xf] %vm15_vm0, %v862_v22   ;;  %v952_v23 = vpop.permute.xlu2 %951  }
 0x141   :  { %1884 = vst.msk [vmem:[%s4104_s1 + $0x104] ss:$8 sm:$0xf0] %vm15_vm0, %v862_v22  }
 0x142   :  { %1881 = vst.msk [vmem:[%s4104_s1 + $0xc4] ss:$8 sm:$0xf] %vm15_vm0, %v853_v49  }
 0x143   :  { %1882 = vst.msk [vmem:[%s4104_s1 + $0xc4] ss:$8 sm:$0xf0] %vm15_vm0, %v853_v49  }
 0x144   :  { %1903 = vst.msk [vmem:[%s4104_s1 + $0x384] ss:$8 sm:$0xf] %vm15_vm0, %v952_v23  }
 0x145   :  { %1264 = vrot.lane.b32.xlu1 %v2136_v4, %s2107_s17  ;;  %1255 = vrot.lane.b32.xlu0 %v2124_v1, %s2107_s17  ;;  %1904 = vst.msk [vmem:[%s4104_s1 + $0x384] ss:$8 sm:$0xf0] %vm15_vm0, %v952_v23   ;;  %v3074_v1 = vld [vmem:[#allocation0 + $0x28] sm:$0xff]  }
 0x146   :  { %1693 = vst.msk [vmem:[%s4104_s1 + $0x140] ss:$8 sm:$0xf] %vm15_vm0, %v3074_v1   ;;  %1273 = vrot.lane.b32.xlu2 %v3032_v21, %s2107_s17 }
 0x147   :  { %v889_v4 = vpop.permute.xlu1 %888   ;;  %v880_v50 = vpop.permute.xlu0 %879   ;;  %1694 = vst.msk [vmem:[%s4104_s1 + $0x140] ss:$8 sm:$0xf0] %vm15_vm0, %v3074_v1  }
 0x148   :  { %1889 = vst.msk [vmem:[%s4104_s1 + $0x1c4] ss:$8 sm:$0xf] %vm15_vm0, %v889_v4   ;;  %v979_v51 = vpop.permute.xlu2 %978  }
 0x149   :  { %1890 = vst.msk [vmem:[%s4104_s1 + $0x1c4] ss:$8 sm:$0xf0] %vm15_vm0, %v889_v4  }
 0x14a   :  { %1887 = vst.msk [vmem:[%s4104_s1 + $0x184] ss:$8 sm:$0xf] %vm15_vm0, %v880_v50  }
 0x14b   :  { %1888 = vst.msk [vmem:[%s4104_s1 + $0x184] ss:$8 sm:$0xf0] %vm15_vm0, %v880_v50  }
 0x14c   :  { %1909 = vst.msk [vmem:[%s4104_s1 + $0x444] ss:$8 sm:$0xf] %vm15_vm0, %v979_v51  }
 0x14d   :  { %1291 = vrot.lane.b32.xlu1 %v2130_v2, %s2107_s17  ;;  %1282 = vrot.lane.b32.xlu0 %v2134_v3, %s2107_s17  ;;  %1910 = vst.msk [vmem:[%s4104_s1 + $0x444] ss:$8 sm:$0xf0] %vm15_vm0, %v979_v51   ;;  %v3116_v2 = vld [vmem:[#allocation0 + $0x40] sm:$0xff]  }
 0x14e   :  { %1699 = vst.msk [vmem:[%s4104_s1 + $0x200] ss:$8 sm:$0xf] %vm15_vm0, %v3116_v2   ;;  %1300 = vrot.lane.b32.xlu2 %v3074_v1, %s2107_s17 }
 0x14f   :  { %v916_v3 = vpop.permute.xlu1 %915   ;;  %v907_v52 = vpop.permute.xlu0 %906   ;;  %1700 = vst.msk [vmem:[%s4104_s1 + $0x200] ss:$8 sm:$0xf0] %vm15_vm0, %v3116_v2  }
 0x150   :  { %1895 = vst.msk [vmem:[%s4104_s1 + $0x284] ss:$8 sm:$0xf] %vm15_vm0, %v916_v3   ;;  %v1006_v53 = vpop.permute.xlu2 %1005  }
 0x151   :  { %1896 = vst.msk [vmem:[%s4104_s1 + $0x284] ss:$8 sm:$0xf0] %vm15_vm0, %v916_v3  }
 0x152   :  { %1893 = vst.msk [vmem:[%s4104_s1 + $0x244] ss:$8 sm:$0xf] %vm15_vm0, %v907_v52  }
 0x153   :  { %1894 = vst.msk [vmem:[%s4104_s1 + $0x244] ss:$8 sm:$0xf0] %vm15_vm0, %v907_v52  }
 0x154   :  { %1915 = vst.msk [vmem:[%s4104_s1 + $0x504] ss:$8 sm:$0xf] %vm15_vm0, %v1006_v53  }
 0x155   :  { %1318 = vrot.lane.b32.xlu1 %v2146_v6, %s2107_s17  ;;  %1309 = vrot.lane.b32.xlu0 %v2148_v7, %s2107_s17  ;;  %1916 = vst.msk [vmem:[%s4104_s1 + $0x504] ss:$8 sm:$0xf0] %vm15_vm0, %v1006_v53   ;;  %v3158_v6 = vld [vmem:[#allocation0 + $0x58] sm:$0xff]  }
 0x156   :  { %1705 = vst.msk [vmem:[%s4104_s1 + $0x2c0] ss:$8 sm:$0xf] %vm15_vm0, %v3158_v6   ;;  %1327 = vrot.lane.b32.xlu2 %v3116_v2, %s2107_s17 }
 0x157   :  { %v943_v7 = vpop.permute.xlu1 %942   ;;  %v934_v54 = vpop.permute.xlu0 %933   ;;  %1706 = vst.msk [vmem:[%s4104_s1 + $0x2c0] ss:$8 sm:$0xf0] %vm15_vm0, %v3158_v6  }
 0x158   :  { %1901 = vst.msk [vmem:[%s4104_s1 + $0x344] ss:$8 sm:$0xf] %vm15_vm0, %v943_v7   ;;  %v1033_v55 = vpop.permute.xlu2 %1032  }
 0x159   :  { %1902 = vst.msk [vmem:[%s4104_s1 + $0x344] ss:$8 sm:$0xf0] %vm15_vm0, %v943_v7  }
 0x15a   :  { %1899 = vst.msk [vmem:[%s4104_s1 + $0x304] ss:$8 sm:$0xf] %vm15_vm0, %v934_v54  }
 0x15b   :  { %1900 = vst.msk [vmem:[%s4104_s1 + $0x304] ss:$8 sm:$0xf0] %vm15_vm0, %v934_v54  }
 0x15c   :  { %1921 = vst.msk [vmem:[%s4104_s1 + $0x5c4] ss:$8 sm:$0xf] %vm15_vm0, %v1033_v55  }
 0x15d   :  { %1345 = vrot.lane.b32.xlu1 %v2158_v9, %s2107_s17  ;;  %1336 = vrot.lane.b32.xlu0 %v2160_v10, %s2107_s17  ;;  %v3196_v9 = vld [vmem:[#allocation0 + $0x60] sm:$0xff]   ;;  %1922 = vst.msk [vmem:[%s4104_s1 + $0x5c4] ss:$8 sm:$0xf0] %vm15_vm0, %v1033_v55  }
 0x15e   :  { %1707 = vst.msk [vmem:[%s4104_s1 + $0x300] ss:$8 sm:$0xf] %vm15_vm0, %v3196_v9   ;;  %1354 = vrot.lane.b32.xlu2 %v3158_v6, %s2107_s17 }
 0x15f   :  { %v970_v10 = vpop.permute.xlu1 %969   ;;  %v961_v56 = vpop.permute.xlu0 %960   ;;  %1708 = vst.msk [vmem:[%s4104_s1 + $0x300] ss:$8 sm:$0xf0] %vm15_vm0, %v3196_v9  }
 0x160   :  { %1907 = vst.msk [vmem:[%s4104_s1 + $0x404] ss:$8 sm:$0xf] %vm15_vm0, %v970_v10   ;;  %v1059_v57 = vpop.permute.xlu2 %1058  }
 0x161   :  { %1908 = vst.msk [vmem:[%s4104_s1 + $0x404] ss:$8 sm:$0xf0] %vm15_vm0, %v970_v10  }
 0x162   :  { %1905 = vst.msk [vmem:[%s4104_s1 + $0x3c4] ss:$8 sm:$0xf] %vm15_vm0, %v961_v56  }
 0x163   :  { %1906 = vst.msk [vmem:[%s4104_s1 + $0x3c4] ss:$8 sm:$0xf0] %vm15_vm0, %v961_v56  }
 0x164   :  { %1927 = vst.msk [vmem:[%s4104_s1 + $0x85] ss:$8 sm:$0xf] %vm15_vm0, %v1059_v57  }
 0x165   :  { %1372 = vrot.lane.b32.xlu1 %v3226_v58, %s2107_s17  ;;  %1363 = vrot.lane.b32.xlu0 %v3196_v9, %s2107_s17  ;;  %1928 = vst.msk [vmem:[%s4104_s1 + $0x85] ss:$8 sm:$0xf0] %vm15_vm0, %v1059_v57  }
 0x166   :  { %1381 = vrot.lane.b32.xlu2 %v3236_v59, %s2107_s17  ;;  %1721 = vst.msk [vmem:[%s4104_s1 + $0x4c0] ss:$8 sm:$0xf] %vm15_vm0, %v3316_v31  }
 0x167   :  { %v997_v61 = vpop.permute.xlu1 %996   ;;  %v988_v62 = vpop.permute.xlu0 %987   ;;  %1722 = vst.msk [vmem:[%s4104_s1 + $0x4c0] ss:$8 sm:$0xf0] %vm15_vm0, %v3316_v31  }
 0x168   :  { %1913 = vst.msk [vmem:[%s4104_s1 + $0x4c4] ss:$8 sm:$0xf] %vm15_vm0, %v997_v61   ;;  %v1086_v63 = vpop.permute.xlu2 %1085  }
 0x169   :  { %1914 = vst.msk [vmem:[%s4104_s1 + $0x4c4] ss:$8 sm:$0xf0] %vm15_vm0, %v997_v61  }
 0x16a   :  { %1911 = vst.msk [vmem:[%s4104_s1 + $0x484] ss:$8 sm:$0xf] %vm15_vm0, %v988_v62  }
 0x16b   :  { %1912 = vst.msk [vmem:[%s4104_s1 + $0x484] ss:$8 sm:$0xf0] %vm15_vm0, %v988_v62  }
 0x16c   :  { %1933 = vst.msk [vmem:[%s4104_s1 + $0x145] ss:$8 sm:$0xf] %vm15_vm0, %v1086_v63  }
 0x16d   :  { %1399 = vrot.lane.b32.xlu1 %v3272_v24, %s2107_s17  ;;  %1390 = vrot.lane.b32.xlu0 %v3274_v25, %s2107_s17  ;;  %1934 = vst.msk [vmem:[%s4104_s1 + $0x145] ss:$8 sm:$0xf0] %vm15_vm0, %v1086_v63  }
 0x16e   :  { %1408 = vrot.lane.b32.xlu2 %v3284_v26, %s2107_s17  ;;  %1723 = vst.msk [vmem:[%s4104_s1 + $0x500] ss:$8 sm:$0xf] %vm15_vm0, %v3328_v33  }
 0x16f   :  { %v1024_v28 = vpop.permute.xlu1 %1023   ;;  %v1015_v29 = vpop.permute.xlu0 %1014   ;;  %1724 = vst.msk [vmem:[%s4104_s1 + $0x500] ss:$8 sm:$0xf0] %vm15_vm0, %v3328_v33  }
 0x170   :  { %1919 = vst.msk [vmem:[%s4104_s1 + $0x584] ss:$8 sm:$0xf] %vm15_vm0, %v1024_v28   ;;  %v1113_v30 = vpop.permute.xlu2 %1112  }
 0x171   :  { %1920 = vst.msk [vmem:[%s4104_s1 + $0x584] ss:$8 sm:$0xf0] %vm15_vm0, %v1024_v28  }
 0x172   :  { %1917 = vst.msk [vmem:[%s4104_s1 + $0x544] ss:$8 sm:$0xf] %vm15_vm0, %v1015_v29  }
 0x173   :  { %1918 = vst.msk [vmem:[%s4104_s1 + $0x544] ss:$8 sm:$0xf0] %vm15_vm0, %v1015_v29  }
 0x174   :  { %1939 = vst.msk [vmem:[%s4104_s1 + $0x205] ss:$8 sm:$0xf] %vm15_vm0, %v1113_v30  }
 0x175   :  { %1426 = vrot.lane.b32.xlu1 %v3316_v31, %s2107_s17  ;;  %1417 = vrot.lane.b32.xlu0 %v3318_v32, %s2107_s17  ;;  %1940 = vst.msk [vmem:[%s4104_s1 + $0x205] ss:$8 sm:$0xf0] %vm15_vm0, %v1113_v30  }
 0x176   :  { %1435 = vrot.lane.b32.xlu2 %v3328_v33, %s2107_s17  ;;  %1725 = vst.msk [vmem:[%s4104_s1 + $0x540] ss:$8 sm:$0xf] %vm15_vm0, %v3362_v39  }
 0x177   :  { %v1050_v35 = vpop.permute.xlu1 %1049   ;;  %v1041_v36 = vpop.permute.xlu0 %1040   ;;  %1726 = vst.msk [vmem:[%s4104_s1 + $0x540] ss:$8 sm:$0xf0] %vm15_vm0, %v3362_v39  }
 0x178   :  { %1925 = vst.msk [vmem:[%s4104_s1 + $0x45] ss:$8 sm:$0xf] %vm15_vm0, %v1050_v35   ;;  %v1140_v37 = vpop.permute.xlu2 %1139  }
 0x179   :  { %1926 = vst.msk [vmem:[%s4104_s1 + $0x45] ss:$8 sm:$0xf0] %vm15_vm0, %v1050_v35  }
 0x17a   :  { %1923 = vst.msk [vmem:[%s4104_s1 + $0x5] ss:$8 sm:$0xf] %vm15_vm0, %v1041_v36  }
 0x17b   :  { %1924 = vst.msk [vmem:[%s4104_s1 + $0x5] ss:$8 sm:$0xf0] %vm15_vm0, %v1041_v36  }
 0x17c   :  { %1945 = vst.msk [vmem:[%s4104_s1 + $0x2c5] ss:$8 sm:$0xf] %vm15_vm0, %v1140_v37  }
 0x17d   :  { %1453 = vrot.lane.b32.xlu1 %v3360_v38, %s2107_s17  ;;  %1444 = vrot.lane.b32.xlu0 %v3362_v39, %s2107_s17  ;;  %1946 = vst.msk [vmem:[%s4104_s1 + $0x2c5] ss:$8 sm:$0xf0] %vm15_vm0, %v1140_v37  }
 0x17e   :  { %1462 = vrot.lane.b32.xlu2 %v3372_v40, %s2107_s17  ;;  %1727 = vst.msk [vmem:[%s4104_s1 + $0x580] ss:$8 sm:$0xf] %vm15_vm0, %v3360_v38  }
 0x17f   :  { %v1077_v42 = vpop.permute.xlu1 %1076   ;;  %v1068_v0 = vpop.permute.xlu0 %1067   ;;  %1728 = vst.msk [vmem:[%s4104_s1 + $0x580] ss:$8 sm:$0xf0] %vm15_vm0, %v3360_v38  }
 0x180   :  { %1931 = vst.msk [vmem:[%s4104_s1 + $0x105] ss:$8 sm:$0xf] %vm15_vm0, %v1077_v42   ;;  %v1167_v43 = vpop.permute.xlu2 %1166  }
 0x181   :  { %1932 = vst.msk [vmem:[%s4104_s1 + $0x105] ss:$8 sm:$0xf0] %vm15_vm0, %v1077_v42  }
 0x182   :  { %1929 = vst.msk [vmem:[%s4104_s1 + $0xc5] ss:$8 sm:$0xf] %vm15_vm0, %v1068_v0  }
 0x183   :  { %1930 = vst.msk [vmem:[%s4104_s1 + $0xc5] ss:$8 sm:$0xf0] %vm15_vm0, %v1068_v0  }
 0x184   :  { %1951 = vst.msk [vmem:[%s4104_s1 + $0x385] ss:$8 sm:$0xf] %vm15_vm0, %v1167_v43  }
 0x185   :  { %1479 = vrot.lane.b32.xlu1 %v1478_v27, %s2108_s29  ;;  %1470 = vrot.lane.b32.xlu0 %v3246_v60, %s2108_s29  ;;  %1952 = vst.msk [vmem:[%s4104_s1 + $0x385] ss:$8 sm:$0xf0] %vm15_vm0, %v1167_v43  }
 0x186   :  { %1488 = vrot.lane.b32.xlu2 %v3032_v21, %s2108_s29  ;;  %1729 = vst.msk [vmem:[%s4104_s1 + $0x5c0] ss:$8 sm:$0xf] %vm15_vm0, %v3372_v40  }
 0x187   :  { %v1104_v5 = vpop.permute.xlu1 %1103   ;;  %v1095_v45 = vpop.permute.xlu0 %1094   ;;  %1730 = vst.msk [vmem:[%s4104_s1 + $0x5c0] ss:$8 sm:$0xf0] %vm15_vm0, %v3372_v40  }
 0x188   :  { %1937 = vst.msk [vmem:[%s4104_s1 + $0x1c5] ss:$8 sm:$0xf] %vm15_vm0, %v1104_v5   ;;  %v1194_v46 = vpop.permute.xlu2 %1193  }
 0x189   :  { %1938 = vst.msk [vmem:[%s4104_s1 + $0x1c5] ss:$8 sm:$0xf0] %vm15_vm0, %v1104_v5  }
 0x18a   :  { %1935 = vst.msk [vmem:[%s4104_s1 + $0x185] ss:$8 sm:$0xf] %vm15_vm0, %v1095_v45  }
 0x18b   :  { %1936 = vst.msk [vmem:[%s4104_s1 + $0x185] ss:$8 sm:$0xf0] %vm15_vm0, %v1095_v45  }
 0x18c   :  { %1957 = vst.msk [vmem:[%s4104_s1 + $0x445] ss:$8 sm:$0xf] %vm15_vm0, %v1194_v46  }
 0x18d   :  { %1506 = vrot.lane.b32.xlu1 %v1505_v41, %s2108_s29  ;;  %1497 = vrot.lane.b32.xlu0 %v1496_v34, %s2108_s29  ;;  %1958 = vst.msk [vmem:[%s4104_s1 + $0x445] ss:$8 sm:$0xf0] %vm15_vm0, %v1194_v46  }
 0x18e   :  { %1515 = vrot.lane.b32.xlu2 %v3074_v1, %s2108_s29 }
 0x18f   :  { %v1131_v47 = vpop.permute.xlu1 %1130   ;;  %v1122_v48 = vpop.permute.xlu0 %1121  }
 0x190   :  { %1943 = vst.msk [vmem:[%s4104_s1 + $0x285] ss:$8 sm:$0xf] %vm15_vm0, %v1131_v47   ;;  %v1221_v11 = vpop.permute.xlu2 %1220  }
 0x191   :  { %1944 = vst.msk [vmem:[%s4104_s1 + $0x285] ss:$8 sm:$0xf0] %vm15_vm0, %v1131_v47  }
 0x192   :  { %1941 = vst.msk [vmem:[%s4104_s1 + $0x245] ss:$8 sm:$0xf] %vm15_vm0, %v1122_v48  }
 0x193   :  { %1942 = vst.msk [vmem:[%s4104_s1 + $0x245] ss:$8 sm:$0xf0] %vm15_vm0, %v1122_v48  }
 0x194   :  { %1963 = vst.msk [vmem:[%s4104_s1 + $0x505] ss:$8 sm:$0xf] %vm15_vm0, %v1221_v11  }
 0x195   :  { %1533 = vrot.lane.b32.xlu1 %v1532_v8, %s2108_s29  ;;  %1524 = vrot.lane.b32.xlu0 %v1523_v44, %s2108_s29  ;;  %1964 = vst.msk [vmem:[%s4104_s1 + $0x505] ss:$8 sm:$0xf0] %vm15_vm0, %v1221_v11  }
 0x196   :  { %1542 = vrot.lane.b32.xlu2 %v3116_v2, %s2108_s29 }
 0x197   :  { %v1158_v13 = vpop.permute.xlu1 %1157   ;;  %v1149_v14 = vpop.permute.xlu0 %1148  }
 0x198   :  { %1949 = vst.msk [vmem:[%s4104_s1 + $0x345] ss:$8 sm:$0xf] %vm15_vm0, %v1158_v13   ;;  %v1248_v15 = vpop.permute.xlu2 %1247  }
 0x199   :  { %1950 = vst.msk [vmem:[%s4104_s1 + $0x345] ss:$8 sm:$0xf0] %vm15_vm0, %v1158_v13  }
 0x19a   :  { %1947 = vst.msk [vmem:[%s4104_s1 + $0x305] ss:$8 sm:$0xf] %vm15_vm0, %v1149_v14  }
 0x19b   :  { %1948 = vst.msk [vmem:[%s4104_s1 + $0x305] ss:$8 sm:$0xf0] %vm15_vm0, %v1149_v14  }
 0x19c   :  { %1969 = vst.msk [vmem:[%s4104_s1 + $0x5c5] ss:$8 sm:$0xf] %vm15_vm0, %v1248_v15  }
 0x19d   :  { %1560 = vrot.lane.b32.xlu1 %v1559_v16, %s2108_s29  ;;  %1551 = vrot.lane.b32.xlu0 %v1550_v12, %s2108_s29  ;;  %1970 = vst.msk [vmem:[%s4104_s1 + $0x5c5] ss:$8 sm:$0xf0] %vm15_vm0, %v1248_v15  }
 0x19e   :  { %1569 = vrot.lane.b32.xlu2 %v3158_v6, %s2108_s29 }
 0x19f   :  { %v1185_v17 = vpop.permute.xlu1 %1184   ;;  %v1176_v18 = vpop.permute.xlu0 %1175  }
 0x1a0   :  { %1955 = vst.msk [vmem:[%s4104_s1 + $0x405] ss:$8 sm:$0xf] %vm15_vm0, %v1185_v17   ;;  %v1274_v19 = vpop.permute.xlu2 %1273  }
 0x1a1   :  { %1956 = vst.msk [vmem:[%s4104_s1 + $0x405] ss:$8 sm:$0xf0] %vm15_vm0, %v1185_v17  }
 0x1a2   :  { %1953 = vst.msk [vmem:[%s4104_s1 + $0x3c5] ss:$8 sm:$0xf] %vm15_vm0, %v1176_v18  }
 0x1a3   :  { %1954 = vst.msk [vmem:[%s4104_s1 + $0x3c5] ss:$8 sm:$0xf0] %vm15_vm0, %v1176_v18  }
 0x1a4   :  { %1975 = vst.msk [vmem:[%s4104_s1 + $0x86] ss:$8 sm:$0xf] %vm15_vm0, %v1274_v19  }
 0x1a5   :  { %1587 = vrot.lane.b32.xlu1 %v3226_v58, %s2108_s29  ;;  %1578 = vrot.lane.b32.xlu0 %v3196_v9, %s2108_s29  ;;  %1976 = vst.msk [vmem:[%s4104_s1 + $0x86] ss:$8 sm:$0xf0] %vm15_vm0, %v1274_v19  }
 0x1a6   :  { %1596 = vrot.lane.b32.xlu2 %v3236_v59, %s2108_s29 }
 0x1a7   :  { %v1212_v20 = vpop.permute.xlu1 %1211   ;;  %v1203_v21 = vpop.permute.xlu0 %1202  }
 0x1a8   :  { %1961 = vst.msk [vmem:[%s4104_s1 + $0x4c5] ss:$8 sm:$0xf] %vm15_vm0, %v1212_v20   ;;  %v1301_v22 = vpop.permute.xlu2 %1300  }
 0x1a9   :  { %1962 = vst.msk [vmem:[%s4104_s1 + $0x4c5] ss:$8 sm:$0xf0] %vm15_vm0, %v1212_v20  }
 0x1aa   :  { %1959 = vst.msk [vmem:[%s4104_s1 + $0x485] ss:$8 sm:$0xf] %vm15_vm0, %v1203_v21  }
 0x1ab   :  { %1960 = vst.msk [vmem:[%s4104_s1 + $0x485] ss:$8 sm:$0xf0] %vm15_vm0, %v1203_v21  }
 0x1ac   :  { %1981 = vst.msk [vmem:[%s4104_s1 + $0x146] ss:$8 sm:$0xf] %vm15_vm0, %v1301_v22  }
 0x1ad   :  { %1614 = vrot.lane.b32.xlu1 %v3272_v24, %s2108_s29  ;;  %1605 = vrot.lane.b32.xlu0 %v3274_v25, %s2108_s29  ;;  %1982 = vst.msk [vmem:[%s4104_s1 + $0x146] ss:$8 sm:$0xf0] %vm15_vm0, %v1301_v22  }
 0x1ae   :  { %1623 = vrot.lane.b32.xlu2 %v3284_v26, %s2108_s29 }
 0x1af   :  { %v1239_v49 = vpop.permute.xlu1 %1238   ;;  %v1230_v23 = vpop.permute.xlu0 %1229  }
 0x1b0   :  { %1967 = vst.msk [vmem:[%s4104_s1 + $0x585] ss:$8 sm:$0xf] %vm15_vm0, %v1239_v49   ;;  %v1328_v1 = vpop.permute.xlu2 %1327  }
 0x1b1   :  { %1968 = vst.msk [vmem:[%s4104_s1 + $0x585] ss:$8 sm:$0xf0] %vm15_vm0, %v1239_v49  }
 0x1b2   :  { %1965 = vst.msk [vmem:[%s4104_s1 + $0x545] ss:$8 sm:$0xf] %vm15_vm0, %v1230_v23  }
 0x1b3   :  { %1966 = vst.msk [vmem:[%s4104_s1 + $0x545] ss:$8 sm:$0xf0] %vm15_vm0, %v1230_v23  }
 0x1b4   :  { %1987 = vst.msk [vmem:[%s4104_s1 + $0x206] ss:$8 sm:$0xf] %vm15_vm0, %v1328_v1  }
 0x1b5   :  { %1641 = vrot.lane.b32.xlu1 %v3316_v31, %s2108_s29  ;;  %1632 = vrot.lane.b32.xlu0 %v3318_v32, %s2108_s29  ;;  %1988 = vst.msk [vmem:[%s4104_s1 + $0x206] ss:$8 sm:$0xf0] %vm15_vm0, %v1328_v1  }
 0x1b6   :  { %1650 = vrot.lane.b32.xlu2 %v3328_v33, %s2108_s29 }
 0x1b7   :  { %v1265_v4 = vpop.permute.xlu1 %1264   ;;  %v1256_v50 = vpop.permute.xlu0 %1255  }
 0x1b8   :  { %1973 = vst.msk [vmem:[%s4104_s1 + $0x46] ss:$8 sm:$0xf] %vm15_vm0, %v1265_v4   ;;  %v1355_v51 = vpop.permute.xlu2 %1354  }
 0x1b9   :  { %1974 = vst.msk [vmem:[%s4104_s1 + $0x46] ss:$8 sm:$0xf0] %vm15_vm0, %v1265_v4  }
 0x1ba   :  { %1971 = vst.msk [vmem:[%s4104_s1 + $0x6] ss:$8 sm:$0xf] %vm15_vm0, %v1256_v50  }
 0x1bb   :  { %1972 = vst.msk [vmem:[%s4104_s1 + $0x6] ss:$8 sm:$0xf0] %vm15_vm0, %v1256_v50  }
 0x1bc   :  { %1993 = vst.msk [vmem:[%s4104_s1 + $0x2c6] ss:$8 sm:$0xf] %vm15_vm0, %v1355_v51  }
 0x1bd   :  { %1668 = vrot.lane.b32.xlu1 %v3360_v38, %s2108_s29  ;;  %1659 = vrot.lane.b32.xlu0 %v3362_v39, %s2108_s29  ;;  %1994 = vst.msk [vmem:[%s4104_s1 + $0x2c6] ss:$8 sm:$0xf0] %vm15_vm0, %v1355_v51  }
 0x1be   :  { %1677 = vrot.lane.b32.xlu2 %v3372_v40, %s2108_s29 }
 0x1bf   :  { %v1292_v2 = vpop.permute.xlu1 %1291   ;;  %v1283_v3 = vpop.permute.xlu0 %1282  }
 0x1c0   :  { %1979 = vst.msk [vmem:[%s4104_s1 + $0x106] ss:$8 sm:$0xf] %vm15_vm0, %v1292_v2   ;;  %v1382_v52 = vpop.permute.xlu2 %1381  }
 0x1c1   :  { %1980 = vst.msk [vmem:[%s4104_s1 + $0x106] ss:$8 sm:$0xf0] %vm15_vm0, %v1292_v2  }
 0x1c2   :  { %1977 = vst.msk [vmem:[%s4104_s1 + $0xc6] ss:$8 sm:$0xf] %vm15_vm0, %v1283_v3  }
 0x1c3   :  { %1978 = vst.msk [vmem:[%s4104_s1 + $0xc6] ss:$8 sm:$0xf0] %vm15_vm0, %v1283_v3  }
 0x1c4   :  { %1999 = vst.msk [vmem:[%s4104_s1 + $0x386] ss:$8 sm:$0xf] %vm15_vm0, %v1382_v52  }
 0x1c5   :  { %2000 = vst.msk [vmem:[%s4104_s1 + $0x386] ss:$8 sm:$0xf0] %vm15_vm0, %v1382_v52  }
 0x1c7   :  { %v1319_v53 = vpop.permute.xlu1 %1318   ;;  %v1310_v6 = vpop.permute.xlu0 %1309  }
 0x1c8   :  { %1985 = vst.msk [vmem:[%s4104_s1 + $0x1c6] ss:$8 sm:$0xf] %vm15_vm0, %v1319_v53   ;;  %v1409_v7 = vpop.permute.xlu2 %1408  }
 0x1c9   :  { %1986 = vst.msk [vmem:[%s4104_s1 + $0x1c6] ss:$8 sm:$0xf0] %vm15_vm0, %v1319_v53  }
 0x1ca   :  { %1983 = vst.msk [vmem:[%s4104_s1 + $0x186] ss:$8 sm:$0xf] %vm15_vm0, %v1310_v6  }
 0x1cb   :  { %1984 = vst.msk [vmem:[%s4104_s1 + $0x186] ss:$8 sm:$0xf0] %vm15_vm0, %v1310_v6  }
 0x1cc   :  { %2005 = vst.msk [vmem:[%s4104_s1 + $0x446] ss:$8 sm:$0xf] %vm15_vm0, %v1409_v7  }
 0x1cd   :  { %2006 = vst.msk [vmem:[%s4104_s1 + $0x446] ss:$8 sm:$0xf0] %vm15_vm0, %v1409_v7  }
 0x1cf   :  { %v1346_v54 = vpop.permute.xlu1 %1345   ;;  %v1337_v55 = vpop.permute.xlu0 %1336  }
 0x1d0   :  { %1991 = vst.msk [vmem:[%s4104_s1 + $0x286] ss:$8 sm:$0xf] %vm15_vm0, %v1346_v54   ;;  %v1436_v9 = vpop.permute.xlu2 %1435  }
 0x1d1   :  { %1992 = vst.msk [vmem:[%s4104_s1 + $0x286] ss:$8 sm:$0xf0] %vm15_vm0, %v1346_v54  }
 0x1d2   :  { %1989 = vst.msk [vmem:[%s4104_s1 + $0x246] ss:$8 sm:$0xf] %vm15_vm0, %v1337_v55  }
 0x1d3   :  { %1990 = vst.msk [vmem:[%s4104_s1 + $0x246] ss:$8 sm:$0xf0] %vm15_vm0, %v1337_v55  }
 0x1d4   :  { %2011 = vst.msk [vmem:[%s4104_s1 + $0x506] ss:$8 sm:$0xf] %vm15_vm0, %v1436_v9  }
 0x1d5   :  { %2012 = vst.msk [vmem:[%s4104_s1 + $0x506] ss:$8 sm:$0xf0] %vm15_vm0, %v1436_v9  }
 0x1d7   :  { %v1373_v10 = vpop.permute.xlu1 %1372   ;;  %v1364_v56 = vpop.permute.xlu0 %1363  }
 0x1d8   :  { %1997 = vst.msk [vmem:[%s4104_s1 + $0x346] ss:$8 sm:$0xf] %vm15_vm0, %v1373_v10   ;;  %v1463_v57 = vpop.permute.xlu2 %1462  }
 0x1d9   :  { %1998 = vst.msk [vmem:[%s4104_s1 + $0x346] ss:$8 sm:$0xf0] %vm15_vm0, %v1373_v10  }
 0x1da   :  { %1995 = vst.msk [vmem:[%s4104_s1 + $0x306] ss:$8 sm:$0xf] %vm15_vm0, %v1364_v56  }
 0x1db   :  { %1996 = vst.msk [vmem:[%s4104_s1 + $0x306] ss:$8 sm:$0xf0] %vm15_vm0, %v1364_v56  }
 0x1dc   :  { %2017 = vst.msk [vmem:[%s4104_s1 + $0x5c6] ss:$8 sm:$0xf] %vm15_vm0, %v1463_v57  }
 0x1dd   :  { %2018 = vst.msk [vmem:[%s4104_s1 + $0x5c6] ss:$8 sm:$0xf0] %vm15_vm0, %v1463_v57  }
 0x1df   :  { %v1400_v58 = vpop.permute.xlu1 %1399   ;;  %v1391_v59 = vpop.permute.xlu0 %1390  }
 0x1e0   :  { %2003 = vst.msk [vmem:[%s4104_s1 + $0x406] ss:$8 sm:$0xf] %vm15_vm0, %v1400_v58   ;;  %v1489_v60 = vpop.permute.xlu2 %1488  }
 0x1e1   :  { %2004 = vst.msk [vmem:[%s4104_s1 + $0x406] ss:$8 sm:$0xf0] %vm15_vm0, %v1400_v58  }
 0x1e2   :  { %2001 = vst.msk [vmem:[%s4104_s1 + $0x3c6] ss:$8 sm:$0xf] %vm15_vm0, %v1391_v59  }
 0x1e3   :  { %2002 = vst.msk [vmem:[%s4104_s1 + $0x3c6] ss:$8 sm:$0xf0] %vm15_vm0, %v1391_v59  }
 0x1e4   :  { %2023 = vst.msk [vmem:[%s4104_s1 + $0x87] ss:$8 sm:$0xf] %vm15_vm0, %v1489_v60  }
 0x1e5   :  { %2024 = vst.msk [vmem:[%s4104_s1 + $0x87] ss:$8 sm:$0xf0] %vm15_vm0, %v1489_v60  }
 0x1e7   :  { %v1427_v61 = vpop.permute.xlu1 %1426   ;;  %v1418_v62 = vpop.permute.xlu0 %1417  }
 0x1e8   :  { %2009 = vst.msk [vmem:[%s4104_s1 + $0x4c6] ss:$8 sm:$0xf] %vm15_vm0, %v1427_v61   ;;  %v1516_v63 = vpop.permute.xlu2 %1515  }
 0x1e9   :  { %2010 = vst.msk [vmem:[%s4104_s1 + $0x4c6] ss:$8 sm:$0xf0] %vm15_vm0, %v1427_v61  }
 0x1ea   :  { %2007 = vst.msk [vmem:[%s4104_s1 + $0x486] ss:$8 sm:$0xf] %vm15_vm0, %v1418_v62  }
 0x1eb   :  { %2008 = vst.msk [vmem:[%s4104_s1 + $0x486] ss:$8 sm:$0xf0] %vm15_vm0, %v1418_v62  }
 0x1ec   :  { %2029 = vst.msk [vmem:[%s4104_s1 + $0x147] ss:$8 sm:$0xf] %vm15_vm0, %v1516_v63  }
 0x1ed   :  { %2030 = vst.msk [vmem:[%s4104_s1 + $0x147] ss:$8 sm:$0xf0] %vm15_vm0, %v1516_v63  }
 0x1ef   :  { %v1454_v24 = vpop.permute.xlu1 %1453   ;;  %v1445_v25 = vpop.permute.xlu0 %1444  }
 0x1f0   :  { %2015 = vst.msk [vmem:[%s4104_s1 + $0x586] ss:$8 sm:$0xf] %vm15_vm0, %v1454_v24   ;;  %v1543_v26 = vpop.permute.xlu2 %1542  }
 0x1f1   :  { %2016 = vst.msk [vmem:[%s4104_s1 + $0x586] ss:$8 sm:$0xf0] %vm15_vm0, %v1454_v24  }
 0x1f2   :  { %2013 = vst.msk [vmem:[%s4104_s1 + $0x546] ss:$8 sm:$0xf] %vm15_vm0, %v1445_v25  }
 0x1f3   :  { %2014 = vst.msk [vmem:[%s4104_s1 + $0x546] ss:$8 sm:$0xf0] %vm15_vm0, %v1445_v25  }
 0x1f4   :  { %2035 = vst.msk [vmem:[%s4104_s1 + $0x207] ss:$8 sm:$0xf] %vm15_vm0, %v1543_v26  }
 0x1f5   :  { %2036 = vst.msk [vmem:[%s4104_s1 + $0x207] ss:$8 sm:$0xf0] %vm15_vm0, %v1543_v26  }
 0x1f7   :  { %v1480_v27 = vpop.permute.xlu1 %1479   ;;  %v1471_v28 = vpop.permute.xlu0 %1470  }
 0x1f8   :  { %2021 = vst.msk [vmem:[%s4104_s1 + $0x47] ss:$8 sm:$0xf] %vm15_vm0, %v1480_v27   ;;  %v1570_v29 = vpop.permute.xlu2 %1569  }
 0x1f9   :  { %2022 = vst.msk [vmem:[%s4104_s1 + $0x47] ss:$8 sm:$0xf0] %vm15_vm0, %v1480_v27  }
 0x1fa   :  { %2019 = vst.msk [vmem:[%s4104_s1 + $0x7] ss:$8 sm:$0xf] %vm15_vm0, %v1471_v28  }
 0x1fb   :  { %2020 = vst.msk [vmem:[%s4104_s1 + $0x7] ss:$8 sm:$0xf0] %vm15_vm0, %v1471_v28  }
 0x1fc   :  { %2041 = vst.msk [vmem:[%s4104_s1 + $0x2c7] ss:$8 sm:$0xf] %vm15_vm0, %v1570_v29  }
 0x1fd   :  { %2042 = vst.msk [vmem:[%s4104_s1 + $0x2c7] ss:$8 sm:$0xf0] %vm15_vm0, %v1570_v29  }
 0x1ff   :  { %v1507_v30 = vpop.permute.xlu1 %1506   ;;  %v1498_v31 = vpop.permute.xlu0 %1497  }
 0x200   :  { %2027 = vst.msk [vmem:[%s4104_s1 + $0x107] ss:$8 sm:$0xf] %vm15_vm0, %v1507_v30   ;;  %v1597_v32 = vpop.permute.xlu2 %1596  }
 0x201   :  { %2028 = vst.msk [vmem:[%s4104_s1 + $0x107] ss:$8 sm:$0xf0] %vm15_vm0, %v1507_v30  }
 0x202   :  { %2025 = vst.msk [vmem:[%s4104_s1 + $0xc7] ss:$8 sm:$0xf] %vm15_vm0, %v1498_v31  }
 0x203   :  { %2026 = vst.msk [vmem:[%s4104_s1 + $0xc7] ss:$8 sm:$0xf0] %vm15_vm0, %v1498_v31  }
 0x204   :  { %2047 = vst.msk [vmem:[%s4104_s1 + $0x387] ss:$8 sm:$0xf] %vm15_vm0, %v1597_v32  }
 0x205   :  { %2048 = vst.msk [vmem:[%s4104_s1 + $0x387] ss:$8 sm:$0xf0] %vm15_vm0, %v1597_v32  }
 0x207   :  { %v1534_v33 = vpop.permute.xlu1 %1533   ;;  %v1525_v34 = vpop.permute.xlu0 %1524  }
 0x208   :  { %2033 = vst.msk [vmem:[%s4104_s1 + $0x1c7] ss:$8 sm:$0xf] %vm15_vm0, %v1534_v33   ;;  %v1624_v35 = vpop.permute.xlu2 %1623  }
 0x209   :  { %2034 = vst.msk [vmem:[%s4104_s1 + $0x1c7] ss:$8 sm:$0xf0] %vm15_vm0, %v1534_v33  }
 0x20a   :  { %2031 = vst.msk [vmem:[%s4104_s1 + $0x187] ss:$8 sm:$0xf] %vm15_vm0, %v1525_v34  }
 0x20b   :  { %2032 = vst.msk [vmem:[%s4104_s1 + $0x187] ss:$8 sm:$0xf0] %vm15_vm0, %v1525_v34  }
 0x20c   :  { %2053 = vst.msk [vmem:[%s4104_s1 + $0x447] ss:$8 sm:$0xf] %vm15_vm0, %v1624_v35  }
 0x20d   :  { %2054 = vst.msk [vmem:[%s4104_s1 + $0x447] ss:$8 sm:$0xf0] %vm15_vm0, %v1624_v35  }
 0x20f   :  { %v1561_v36 = vpop.permute.xlu1 %1560   ;;  %v1552_v37 = vpop.permute.xlu0 %1551  }
 0x210   :  { %2039 = vst.msk [vmem:[%s4104_s1 + $0x287] ss:$8 sm:$0xf] %vm15_vm0, %v1561_v36   ;;  %v1651_v38 = vpop.permute.xlu2 %1650  }
 0x211   :  { %2040 = vst.msk [vmem:[%s4104_s1 + $0x287] ss:$8 sm:$0xf0] %vm15_vm0, %v1561_v36  }
 0x212   :  { %2037 = vst.msk [vmem:[%s4104_s1 + $0x247] ss:$8 sm:$0xf] %vm15_vm0, %v1552_v37  }
 0x213   :  { %2038 = vst.msk [vmem:[%s4104_s1 + $0x247] ss:$8 sm:$0xf0] %vm15_vm0, %v1552_v37  }
 0x214   :  { %2059 = vst.msk [vmem:[%s4104_s1 + $0x507] ss:$8 sm:$0xf] %vm15_vm0, %v1651_v38  }
 0x215   :  { %2060 = vst.msk [vmem:[%s4104_s1 + $0x507] ss:$8 sm:$0xf0] %vm15_vm0, %v1651_v38  }
 0x217   :  { %v1588_v39 = vpop.permute.xlu1 %1587   ;;  %v1579_v40 = vpop.permute.xlu0 %1578  }
 0x218   :  { %2045 = vst.msk [vmem:[%s4104_s1 + $0x347] ss:$8 sm:$0xf] %vm15_vm0, %v1588_v39   ;;  %v1678_v41 = vpop.permute.xlu2 %1677  }
 0x219   :  { %2046 = vst.msk [vmem:[%s4104_s1 + $0x347] ss:$8 sm:$0xf0] %vm15_vm0, %v1588_v39  }
 0x21a   :  { %2043 = vst.msk [vmem:[%s4104_s1 + $0x307] ss:$8 sm:$0xf] %vm15_vm0, %v1579_v40  }
 0x21b   :  { %2044 = vst.msk [vmem:[%s4104_s1 + $0x307] ss:$8 sm:$0xf0] %vm15_vm0, %v1579_v40  }
 0x21c   :  { %2065 = vst.msk [vmem:[%s4104_s1 + $0x5c7] ss:$8 sm:$0xf] %vm15_vm0, %v1678_v41  }
 0x21d   :  { %2066 = vst.msk [vmem:[%s4104_s1 + $0x5c7] ss:$8 sm:$0xf0] %vm15_vm0, %v1678_v41  }
 0x21f   :  { %v1615_v42 = vpop.permute.xlu1 %1614   ;;  %v1606_v0 = vpop.permute.xlu0 %1605  }
 0x220   :  { %2051 = vst.msk [vmem:[%s4104_s1 + $0x407] ss:$8 sm:$0xf] %vm15_vm0, %v1615_v42  }
 0x221   :  { %2052 = vst.msk [vmem:[%s4104_s1 + $0x407] ss:$8 sm:$0xf0] %vm15_vm0, %v1615_v42  }
 0x222   :  { %2049 = vst.msk [vmem:[%s4104_s1 + $0x3c7] ss:$8 sm:$0xf] %vm15_vm0, %v1606_v0  }
 0x223   :  { %2050 = vst.msk [vmem:[%s4104_s1 + $0x3c7] ss:$8 sm:$0xf0] %vm15_vm0, %v1606_v0  }
 0x227   :  { %v1642_v43 = vpop.permute.xlu1 %1641   ;;  %v1633_v44 = vpop.permute.xlu0 %1632  }
 0x228   :  { %2057 = vst.msk [vmem:[%s4104_s1 + $0x4c7] ss:$8 sm:$0xf] %vm15_vm0, %v1642_v43  }
 0x229   :  { %2058 = vst.msk [vmem:[%s4104_s1 + $0x4c7] ss:$8 sm:$0xf0] %vm15_vm0, %v1642_v43  }
 0x22a   :  { %2055 = vst.msk [vmem:[%s4104_s1 + $0x487] ss:$8 sm:$0xf] %vm15_vm0, %v1633_v44  }
 0x22b   :  { %2056 = vst.msk [vmem:[%s4104_s1 + $0x487] ss:$8 sm:$0xf0] %vm15_vm0, %v1633_v44  }
 0x22f   :  { %v1669_v5 = vpop.permute.xlu1 %1668   ;;  %v1660_v45 = vpop.permute.xlu0 %1659  }
 0x230   :  { %2063 = vst.msk [vmem:[%s4104_s1 + $0x587] ss:$8 sm:$0xf] %vm15_vm0, %v1669_v5  }
 0x231   :  { %2064 = vst.msk [vmem:[%s4104_s1 + $0x587] ss:$8 sm:$0xf0] %vm15_vm0, %v1669_v5  }
 0x232   :  { %2061 = vst.msk [vmem:[%s4104_s1 + $0x547] ss:$8 sm:$0xf] %vm15_vm0, %v1660_v45  }
 0x233   :  { %2062 = vst.msk [vmem:[%s4104_s1 + $0x547] ss:$8 sm:$0xf0] %vm15_vm0, %v1660_v45  }
 0x234   :  { %1684 = vsyncpa [#allocation1], 1 }

// kernel: embed_position.1
= control target key start
LH: loop header
LB: loop body
LE: loop exit
PB: predicated region body
PF: predicated region fallthrough
CT: control target
= control target key end

     0   :  { %s947_s9 = smov 0   ;;  %s949_s10 = smov 0   ;;  %s1399_s0 = inlined_call_operand.vmem [shape: f32[3,64,64], index: 0, kind: input, shape index: {}]   ;;  %s1400_s1 = inlined_call_operand.vmem [shape: f32[3,32,64], index: 1, kind: input, shape index: {}]   ;;  %s1401_s2 = inlined_call_operand.vmem [shape: f32[64,64], index: 2, kind: output, shape index: {}]  }
   0x1   :  { %s951_s11 = smov 0   ;;  %s953_s12 = smov 0  }
   0x2   :  { %s955_s13 = smov 0   ;;  %s957_s14 = smov 0  }
   0x3   :  { %s959_s15 = smov 0   ;;  %s961_s16 = smov 0  }
   0x4   :  { %s963_s17 = smov 0  }
   0x5 LB: > { %s21_s18 = sadd.s32 1, %s921_s15  ;;  %s24_s19 = sadd.s32 1, %s925_s16  ;;  %s929_s17 = sphi %s963_s17, %s12_s17   ;;  %s925_s16 = sphi %s961_s16, %s1457_s16   ;;  %s921_s15 = sphi %s959_s15, %s1456_s15   ;;  %s917_s14 = sphi %s957_s14, %s1455_s14   ;;  %s913_s13 = sphi %s955_s13, %s1454_s13   ;;  %s909_s12 = sphi %s953_s12, %s1453_s12   ;;  %s905_s11 = sphi %s951_s11, %s1452_s11   ;;  %s901_s10 = sphi %s949_s10, %s1451_s10   ;;  %s897_s9 = sphi %s947_s9, %s1450_s9  }
   0x6   : > { %p22_p0 = scmp.ge.s32.totalorder %s21_s18, 4  ;;  %s31_s20 = sadd.s32 1, %s909_s12 }
   0x7   : > { %p38_p1 = scmp.ne.s32.totalorder %s909_s12, %s905_s11  ;;  %p39_p2 = scmp.eq.s32.totalorder %s929_s17, 0 }
   0x8   : > { %s1459_s18 = smov (%p22_p0, %s21_s18), 0  ;;  %s1461_s19 = smov (!%p22_p0, %s24_s19), %s925_s16 }
   0x9   : > { %p1001_p3 = por %p39_p2, %p38_p1  ;;  %s54_s22 = ssub.s32 %s921_s15, %s1459_s18 }
   0xa   : > { %p26_p4 = scmp.ge.s32.totalorder %s1461_s19, 2  ;;  %p55_p5 = scmp.eq.s32.totalorder %s54_s22, 0 }
   0xb   : > { %s57_s23 = sadd.s32 1, %s901_s10  ;;  %p64_p6 = scmp.ne.s32.totalorder %s901_s10, %s897_s9 }
   0xc   : > { %s1463_s19 = smov (%p26_p4, %s1461_s19), 0  ;;  %p761_p9 = scmp.ge.s32.totalorder %s929_s17, 8 }
   0xd   : > { %s1013_s24 = scalar_select %p55_p5, %s901_s10, %s57_s23  }
   0xe   : > { %s28_s25 = ssub.s32 %s925_s16, %s1463_s19  ;;  %p1017_p7 = por %p64_p6, %p39_p2 }
   0xf   : > { %p29_p8 = scmp.eq.s32.totalorder %s28_s25, 0  ;;  %116 = sbr.rel (%p761_p9) target bundleno = 43 (0x2b), region = 16 }
  0x11   : > { %s1022_s27 = scalar_select %p29_p8, %s909_s12, %s31_s20  }
  0x14   : > { %119 = sbr.rel (!%p1001_p3) target bundleno = 36 (0x24), region = 20  ;;  %s121_s28 = sand.u32 (%p1001_p3), 1, %s909_s12  }
  0x15   : > { %s781_s29 = sshll.u32 (%p1001_p3), %s925_s16, 5  ;;  %s782_s30 = smul.u32 (%p1001_p3), 96, %s121_s28 }
  0x16   : > { %s126_s5 = scalar_lea.vmem (%p1001_p3), %s1399_s0, %s781_s29 }
  0x17   : > { %v177_v0 = vld [vmem:[%s126_s5] sm:$0xff] (%p1001_p3)  ;;  %v179_v1 = vld [vmem:[%s126_s5 + $0x8] sm:$0xff] (%p1001_p3)  ;;  %v181_v2 = vld [vmem:[%s126_s5 + $0x10] sm:$0xff] (%p1001_p3)  ;;  %s123_s6 = scalar_lea.vmem (%p1001_p3), [#allocation2], %s782_s30 }
  0x18   : > { %178 = vst [vmem:[%s123_s6] sm:$0xff] (%p1001_p3), %v177_v0  ;;  %v183_v3 = vld [vmem:[%s126_s5 + $0x18] sm:$0xff] (%p1001_p3)  ;;  %v185_v4 = vld [vmem:[%s126_s5 + $0x40] sm:$0xff] (%p1001_p3)  ;;  %v187_v5 = vld [vmem:[%s126_s5 + $0x48] sm:$0xff] (%p1001_p3) }
  0x19   : > { %180 = vst [vmem:[%s123_s6 + $0x8] sm:$0xff] %v179_v1  ;;  %v189_v6 = vld [vmem:[%s126_s5 + $0x50] sm:$0xff]  ;;  %v191_v7 = vld [vmem:[%s126_s5 + $0x58] sm:$0xff]  ;;  %v193_v8 = vld [vmem:[%s126_s5 + $0x80] sm:$0xff] }
  0x1a   : > { %182 = vst [vmem:[%s123_s6 + $0x10] sm:$0xff] %v181_v2  ;;  %v195_v9 = vld [vmem:[%s126_s5 + $0x88] sm:$0xff]  ;;  %v197_v10 = vld [vmem:[%s126_s5 + $0x90] sm:$0xff]  ;;  %v199_v11 = vld [vmem:[%s126_s5 + $0x98] sm:$0xff] }
  0x1b   : > { %184 = vst [vmem:[%s123_s6 + $0x18] sm:$0xff] %v183_v3 }
  0x1c   : > { %186 = vst [vmem:[%s123_s6 + $0x20] sm:$0xff] %v185_v4 }
  0x1d   : > { %188 = vst [vmem:[%s123_s6 + $0x28] sm:$0xff] %v187_v5 }
  0x1e   : > { %190 = vst [vmem:[%s123_s6 + $0x30] sm:$0xff] %v189_v6 }
  0x1f   : > { %192 = vst [vmem:[%s123_s6 + $0x38] sm:$0xff] %v191_v7 }
  0x20   : > { %194 = vst [vmem:[%s123_s6 + $0x40] sm:$0xff] %v193_v8 }
  0x21   : > { %196 = vst [vmem:[%s123_s6 + $0x48] sm:$0xff] %v195_v9 }
  0x22   : > { %198 = vst [vmem:[%s123_s6 + $0x50] sm:$0xff] %v197_v10 }
  0x23   : > { %200 = vst [vmem:[%s123_s6 + $0x58] sm:$0xff] %v199_v11 }
  0x24 PF: > { %206 = sbr.rel (!%p1017_p7) target bundleno = 43 (0x2b), region = 58  ;;  %s208_s7 = sand.u32 (%p1017_p7), 1, %s901_s10  }
  0x25   : > { %s764_s8 = sshll.u32 (%p1017_p7), %s921_s15, 3  ;;  %s783_s20 = smul.u32 (%p1017_p7), 24, %s208_s7 }
  0x26   : > { %s212_s23 = scalar_lea.vmem (%p1017_p7), %s1400_s1, %s764_s8 }
  0x27   : > { %v245_v12 = vld [vmem:[%s212_s23] sm:$0xff] (%p1017_p7)  ;;  %s210_s25 = scalar_lea.vmem (%p1017_p7), [#allocation3], %s783_s20 }
  0x28   : > { %v247_v13 = vld [vmem:[%s212_s23 + $0x20] sm:$0xff] (%p1017_p7)  ;;  %246 = vst [vmem:[%s210_s25] sm:$0xff] (%p1017_p7), %v245_v12 }
  0x29   : > { %v249_v14 = vld [vmem:[%s212_s23 + $0x40] sm:$0xff]  ;;  %248 = vst [vmem:[%s210_s25 + $0x8] sm:$0xff] %v247_v13 }
  0x2a   : > { %250 = vst [vmem:[%s210_s25 + $0x10] sm:$0xff] %v249_v14 }
  0x2b PF: > { %p765_p10 = scmp.ge.s32.totalorder %s929_s17, 1  ;;  %p255_p11 = scmp.lt.s32.totalorder %s929_s17, 9 }
  0x2d   : > { %p256_p12 = pnand %p765_p10, %p255_p11 }
  0x2f   : > { %259 = sbr.rel (%p256_p12) target bundleno = 151 (0x97), region = 96 }
  0x34   : > { %s262_s26 = sand.u32 1, %s905_s11   ;;  %s269_s28 = sand.u32 1, %s897_s9  }
  0x35   : > { %s784_s29 = smul.u32 96, %s262_s26  ;;  %s766_s30 = sshll.u32 %s917_s14, 2 }
  0x36   : > { %s785_s3 = smul.u32 24, %s269_s28  ;;  %p296_p13 = scmp.lt.s32.totalorder %s766_s30, 7 }
  0x37   : > { %s1049_s8 = scalar_lea.vmem [#allocation2], %s784_s29  ;;  %p768_p0 = scmp.ne.s32.totalorder %s913_s13, 0 }
  0x38   : > { %s1465_s30 = smov (!%p296_p13, %s766_s30), 7  ;;  %s1051_s20 = scalar_lea.vmem [#allocation3], %s785_s3 }
  0x39   : > { %s767_s4 = sshll.u32 %s1465_s30, 3  ;;  %304 = sbr.rel (%p768_p0) target bundleno = 67 (0x43), region = 108 }
  0x3a   : > { %s1047_s7 = scalar_lea.vmem %s1401_s2, %s767_s4 }
  0x3e   : > { %vm305_vm0 = vcmask 523264   ;;  %v931_v15 = vmov 0.0  }
  0x3f   : > { %306 = vst.msk [vmem:[%s1047_s7] sm:$0xff] %vm305_vm0, %v931_v15 }
  0x40   : > { %307 = vst.msk [vmem:[%s1047_s7 + $0x8] sm:$0xff] %vm305_vm0, %v931_v15 }
  0x41   : > { %308 = vst.msk [vmem:[%s1047_s7 + $0x10] sm:$0xff] %vm305_vm0, %v931_v15 }
  0x42   : > { %309 = vst.msk [vmem:[%s1047_s7 + $0x18] sm:$0xff] %vm305_vm0, %v931_v15 }
  0x43 PF: > { %v314_v16 = vld [vmem:[%s1051_s20] sm:$0xff]  ;;  %v311_v26 = vld [vmem:[%s1049_s8 + $0x8] sm:$0xff]  ;;  %v312_v28 = vld [vmem:[%s1049_s8 + $0x10] sm:$0xff]  ;;  %vm597_vm1 = vcmask 523264  }
  0x44   : > { %v316_v17 = vrot.slane %v314_v16, 1  ;;  %v317_v18 = vrot.slane %v314_v16, 2  ;;  %v318_v19 = vrot.slane %v314_v16, 3  ;;  %v319_v20 = vrot.slane %v314_v16, 4  ;;  %v310_v25 = vld [vmem:[%s1049_s8] sm:$0xff]  ;;  %v313_v29 = vld [vmem:[%s1049_s8 + $0x18] sm:$0xff] }
  0x45   : > { %v320_v21 = vrot.slane %v314_v16, 5  ;;  %v321_v22 = vrot.slane %v314_v16, 6  ;;  %v322_v23 = vrot.slane %v314_v16, 7  ;;  %v323_v24 = vperm.slane %v314_v16, 0  ;;  %v773_v46 = vld [vmem:[%s1051_s20 + $0x8] sm:$0xff]  ;;  %v771_v12 = vld [vmem:[%s1049_s8 + $0x30] sm:$0xff] }
  0x46   : > { %v324_v27 = vperm.slane %v316_v17, 0  ;;  %v325_v30 = vperm.slane %v317_v18, 0  ;;  %v326_v31 = vperm.slane %v318_v19, 0  ;;  %v327_v32 = vperm.slane %v319_v20, 0  ;;  %v769_v10 = vld [vmem:[%s1049_s8 + $0x20] sm:$0xff]  ;;  %v770_v11 = vld [vmem:[%s1049_s8 + $0x28] sm:$0xff] }
  0x47   : > { %v328_v33 = vperm.slane %v320_v21, 0  ;;  %v329_v34 = vperm.slane %v321_v22, 0  ;;  %v330_v35 = vperm.slane %v322_v23, 0  ;;  %v1063_v36 = vmul.f32 %v323_v24, %v310_v25  ;;  %v772_v17 = vld [vmem:[%s1049_s8 + $0x38] sm:$0xff] }
  0x48   : > { %v1065_v37 = vmul.f32 %v323_v24, %v311_v26  ;;  %v1067_v38 = vmul.f32 %v323_v24, %v312_v28  ;;  %v1069_v39 = vmul.f32 %v323_v24, %v313_v29  ;;  %v1071_v40 = vmul.f32 %v324_v27, %v310_v25 }
  0x49   : > { %v1073_v41 = vmul.f32 %v324_v27, %v311_v26  ;;  %v1075_v42 = vmul.f32 %v324_v27, %v312_v28  ;;  %v1077_v43 = vmul.f32 %v324_v27, %v313_v29  ;;  %v1079_v44 = vmul.f32 %v325_v30, %v310_v25 }
  0x4a   : > { %v1081_v45 = vmul.f32 %v325_v30, %v311_v26  ;;  %v1084_v47 = vmul.f32 %v325_v30, %v312_v28  ;;  %v1086_v48 = vmul.f32 %v325_v30, %v313_v29  ;;  %v1088_v49 = vmul.f32 %v326_v31, %v310_v25 }
  0x4b   : > { %v1090_v50 = vmul.f32 %v326_v31, %v311_v26  ;;  %v1092_v51 = vmul.f32 %v326_v31, %v312_v28  ;;  %v1094_v52 = vmul.f32 %v326_v31, %v313_v29  ;;  %v1096_v53 = vmul.f32 %v327_v32, %v310_v25 }
  0x4c   : > { %v1098_v54 = vmul.f32 %v327_v32, %v311_v26  ;;  %v1100_v55 = vmul.f32 %v327_v32, %v312_v28  ;;  %v1102_v56 = vmul.f32 %v327_v32, %v313_v29  ;;  %v1104_v57 = vmul.f32 %v328_v33, %v310_v25 }
  0x4d   : > { %v379_v58 = vrot.slane %v773_v46, 1  ;;  %v1106_v59 = vmul.f32 %v328_v33, %v311_v26  ;;  %v1108_v60 = vmul.f32 %v328_v33, %v312_v28  ;;  %v1110_v61 = vmul.f32 %v328_v33, %v313_v29 }
  0x4e   : > { %v380_v62 = vrot.slane %v773_v46, 2  ;;  %v381_v63 = vrot.slane %v773_v46, 3  ;;  %v382_v0 = vrot.slane %v773_v46, 4  ;;  %v383_v1 = vrot.slane %v773_v46, 5 }
  0x4f   : > { %1404 = vst [vmem:[#allocation4_spill] sm:$0xff] %v1106_v59  ;;  %v384_v2 = vrot.slane %v773_v46, 6  ;;  %v1112_v3 = vmul.f32 %v329_v34, %v310_v25  ;;  %v1114_v4 = vmul.f32 %v329_v34, %v311_v26  ;;  %v385_v5 = vrot.slane %v773_v46, 7 }
  0x50   : > { %1405 = vst [vmem:[#allocation5_spill] sm:$0xff] %v1108_v60  ;;  %v386_v6 = vperm.slane %v773_v46, 0  ;;  %v1116_v7 = vmul.f32 %v329_v34, %v312_v28  ;;  %v1118_v8 = vmul.f32 %v329_v34, %v313_v29  ;;  %v1120_v9 = vmul.f32 %v330_v35, %v310_v25 }
  0x51   : > { %1406 = vst [vmem:[#allocation6_spill] sm:$0xff] %v1110_v61  ;;  %v387_v13 = vperm.slane %v379_v58, 0  ;;  %v1125_v14 = vmul.f32 %v330_v35, %v311_v26  ;;  %v1127_v15 = vmul.f32 %v330_v35, %v312_v28  ;;  %v1129_v16 = vmul.f32 %v330_v35, %v313_v29 }
  0x52   : > { %1407 = vst [vmem:[#allocation7_spill] sm:$0xff] %v1112_v3  ;;  %v388_v18 = vperm.slane %v380_v62, 0  ;;  %v389_v19 = vperm.slane %v381_v63, 0  ;;  %v390_v20 = vperm.slane %v382_v0, 0  ;;  %v391_v21 = vperm.slane %v383_v1, 0 }
  0x53   : > { %1408 = vst [vmem:[#allocation8_spill] sm:$0xff] %v1114_v4  ;;  %v392_v22 = vperm.slane %v384_v2, 0  ;;  %v393_v23 = vperm.slane %v385_v5, 0  ;;  %v402_v24 = vmul.f32 %v769_v10, %v386_v6  ;;  %v403_v25 = vmul.f32 %v770_v11, %v386_v6 }
  0x54   : > { %1409 = vst [vmem:[#allocation9_spill] sm:$0xff] %v1116_v7  ;;  %v404_v27 = vmul.f32 %v771_v12, %v386_v6  ;;  %v405_v30 = vmul.f32 %v772_v17, %v386_v6  ;;  %v406_v31 = vmul.f32 %v769_v10, %v387_v13  ;;  %v407_v32 = vmul.f32 %v770_v11, %v387_v13 }
  0x55   : > { %1410 = vst [vmem:[#allocation10_spill] sm:$0xff] %v1118_v8  ;;  %v408_v33 = vmul.f32 %v771_v12, %v387_v13  ;;  %v409_v26 = vmul.f32 %v772_v17, %v387_v13  ;;  %v410_v34 = vmul.f32 %v769_v10, %v388_v18  ;;  %v411_v28 = vmul.f32 %v770_v11, %v388_v18 }
  0x56   : > { %1411 = vst [vmem:[#allocation11_spill] sm:$0xff] %v1120_v9  ;;  %v412_v46 = vmul.f32 %v771_v12, %v388_v18  ;;  %v413_v29 = vmul.f32 %v772_v17, %v388_v18  ;;  %v414_v35 = vmul.f32 %v769_v10, %v389_v19  ;;  %v415_v58 = vmul.f32 %v770_v11, %v389_v19 }
  0x57   : > { %1412 = vst [vmem:[#allocation12_spill] sm:$0xff] %v1125_v14  ;;  %v416_v62 = vmul.f32 %v771_v12, %v389_v19  ;;  %v417_v63 = vmul.f32 %v772_v17, %v389_v19  ;;  %v418_v0 = vmul.f32 %v769_v10, %v390_v20  ;;  %v419_v1 = vmul.f32 %v770_v11, %v390_v20 }
  0x58   : > { %1413 = vst [vmem:[#allocation13_spill] sm:$0xff] %v1127_v15  ;;  %v420_v2 = vmul.f32 %v771_v12, %v390_v20  ;;  %v421_v5 = vmul.f32 %v772_v17, %v390_v20  ;;  %v423_v15 = vmul.f32 %v770_v11, %v391_v21  ;;  %v424_v14 = vmul.f32 %v771_v12, %v391_v21 }
  0x59   : > { %1414 = vst [vmem:[#allocation14_spill] sm:$0xff] %v1129_v16  ;;  %v422_v16 = vmul.f32 %v769_v10, %v391_v21  ;;  %v425_v6 = vmul.f32 %v772_v17, %v391_v21  ;;  %v426_v9 = vmul.f32 %v769_v10, %v392_v22  ;;  %v427_v8 = vmul.f32 %v770_v11, %v392_v22 }
  0x5a   : > { %v428_v7 = vmul.f32 %v771_v12, %v392_v22  ;;  %v429_v13 = vmul.f32 %v772_v17, %v392_v22  ;;  %v430_v4 = vmul.f32 %v769_v10, %v393_v23  ;;  %v431_v3 = vmul.f32 %v770_v11, %v393_v23  ;;  %v1418_v22 = vld [vmem:[#allocation5_spill] sm:$0xff] }
  0x5b   : > { %v432_v18 = vmul.f32 %v771_v12, %v393_v23  ;;  %v433_v61 = vmul.f32 %v772_v17, %v393_v23  ;;  %v1133_v60 = vadd.f32 %v402_v24, %v1063_v36  ;;  %v1136_v19 = vadd.f32 %v403_v25, %v1065_v37  ;;  %v1420_v23 = vld [vmem:[#allocation6_spill] sm:$0xff] }
  0x5c   : > { %v1139_v20 = vadd.f32 %v404_v27, %v1067_v38  ;;  %v1142_v21 = vadd.f32 %v405_v30, %v1069_v39  ;;  %v1145_v59 = vadd.f32 %v406_v31, %v1071_v40  ;;  %v1148_v10 = vadd.f32 %v407_v32, %v1073_v41  ;;  %v778_v40 = vld [vmem:[%s1051_s20 + $0x10] sm:$0xff] }
  0x5d   : > { %v1151_v11 = vadd.f32 %v408_v33, %v1075_v42  ;;  %v1154_v36 = vadd.f32 %v409_v26, %v1077_v43  ;;  %v1157_v37 = vadd.f32 %v410_v34, %v1079_v44  ;;  %v1160_v38 = vadd.f32 %v411_v28, %v1081_v45  ;;  %v774_v33 = vld [vmem:[%s1049_s8 + $0x40] sm:$0xff] }
  0x5e   : > { %v1163_v39 = vadd.f32 %v412_v46, %v1084_v47  ;;  %v1167_v12 = vadd.f32 %v413_v29, %v1086_v48  ;;  %v1170_v41 = vadd.f32 %v414_v35, %v1088_v49  ;;  %v1173_v42 = vadd.f32 %v415_v58, %v1090_v50  ;;  %v1428_v34 = vld [vmem:[#allocation10_spill] sm:$0xff]  ;;  %v1430_v46 = vld [vmem:[#allocation11_spill] sm:$0xff]  ;;  %v1432_v35 = vld [vmem:[#allocation12_spill] sm:$0xff] }
  0x5f   : > { %v1176_v43 = vadd.f32 %v416_v62, %v1092_v51  ;;  %v1179_v44 = vadd.f32 %v417_v63, %v1094_v52  ;;  %v1182_v45 = vadd.f32 %v418_v0, %v1096_v53  ;;  %v1185_v47 = vadd.f32 %v419_v1, %v1098_v54  ;;  %v1416_v51 = vld [vmem:[#allocation4_spill] sm:$0xff]  ;;  %v775_v62 = vld [vmem:[%s1049_s8 + $0x48] sm:$0xff]  ;;  %v777_v63 = vld [vmem:[%s1049_s8 + $0x58] sm:$0xff] }
  0x60   : > { %v1188_v48 = vadd.f32 %v420_v2, %v1100_v55  ;;  %v1191_v49 = vadd.f32 %v421_v5, %v1102_v56  ;;  %v1194_v50 = vadd.f32 %v422_v16, %v1104_v57  ;;  %v1197_v17 = vadd.f32 %v423_v15, %v1416_v51  ;;  %v1422_v16 = vld [vmem:[#allocation7_spill] sm:$0xff]  ;;  %v1424_v15 = vld [vmem:[#allocation8_spill] sm:$0xff] }
  0x61   : > { %v474_v52 = vrot.slane %v778_v40, 1  ;;  %v1200_v53 = vadd.f32 %v424_v14, %v1418_v22  ;;  %v1203_v54 = vadd.f32 %v425_v6, %v1420_v23  ;;  %v475_v55 = vrot.slane %v778_v40, 2  ;;  %v1426_v14 = vld [vmem:[#allocation9_spill] sm:$0xff] }
  0x62   : > { %1415 = vst [vmem:[#allocation15_spill] sm:$0xff] %v1194_v50  ;;  %v476_v24 = vrot.slane %v778_v40, 3  ;;  %v477_v56 = vrot.slane %v778_v40, 4  ;;  %v478_v25 = vrot.slane %v778_v40, 5  ;;  %v479_v27 = vrot.slane %v778_v40, 6 }
  0x63   : > { %1417 = vst [vmem:[#allocation4_spill] sm:$0xff] %v1197_v17  ;;  %v480_v57 = vrot.slane %v778_v40, 7  ;;  %v1206_v30 = vadd.f32 %v426_v9, %v1422_v16  ;;  %v1209_v31 = vadd.f32 %v427_v8, %v1424_v15  ;;  %v1212_v32 = vadd.f32 %v428_v7, %v1426_v14  ;;  %v776_v9 = vld [vmem:[%s1049_s8 + $0x50] sm:$0xff]  ;;  %v1434_v8 = vld [vmem:[#allocation13_spill] sm:$0xff]  ;;  %v1436_v7 = vld [vmem:[#allocation14_spill] sm:$0xff] }
  0x64   : > { %1419 = vst [vmem:[#allocation5_spill] sm:$0xff] %v1200_v53  ;;  %v481_v26 = vperm.slane %v778_v40, 0  ;;  %v1216_v28 = vadd.f32 %v429_v13, %v1428_v34  ;;  %v1219_v29 = vadd.f32 %v430_v4, %v1430_v46  ;;  %v1222_v58 = vadd.f32 %v431_v3, %v1432_v35 }
  0x65   : > { %1421 = vst [vmem:[#allocation6_spill] sm:$0xff] %v1203_v54  ;;  %v482_v0 = vperm.slane %v474_v52, 0  ;;  %v1228_v1 = vadd.f32 %v432_v18, %v1434_v8  ;;  %v1231_v2 = vadd.f32 %v433_v61, %v1436_v7  ;;  %v483_v5 = vperm.slane %v475_v55, 0 }
  0x66   : > { %1423 = vst [vmem:[#allocation7_spill] sm:$0xff] %v1206_v30  ;;  %v484_v6 = vperm.slane %v476_v24, 0  ;;  %v485_v13 = vperm.slane %v477_v56, 0  ;;  %v486_v40 = vperm.slane %v478_v25, 0  ;;  %v487_v51 = vperm.slane %v479_v27, 0 }
  0x67   : > { %1425 = vst [vmem:[#allocation8_spill] sm:$0xff] %v1209_v31  ;;  %v488_v4 = vperm.slane %v480_v57, 0  ;;  %v497_v22 = vmul.f32 %v774_v33, %v481_v26  ;;  %v498_v23 = vmul.f32 %v775_v62, %v481_v26  ;;  %v499_v3 = vmul.f32 %v776_v9, %v481_v26 }
  0x68   : > { %1427 = vst [vmem:[#allocation9_spill] sm:$0xff] %v1212_v32  ;;  %v500_v16 = vmul.f32 %v777_v63, %v481_v26  ;;  %v501_v15 = vmul.f32 %v774_v33, %v482_v0  ;;  %v502_v14 = vmul.f32 %v775_v62, %v482_v0  ;;  %v503_v34 = vmul.f32 %v776_v9, %v482_v0 }
  0x69   : > { %1429 = vst [vmem:[#allocation10_spill] sm:$0xff] %v1216_v28  ;;  %v504_v52 = vmul.f32 %v777_v63, %v482_v0  ;;  %v505_v46 = vmul.f32 %v774_v33, %v483_v5  ;;  %v506_v18 = vmul.f32 %v775_v62, %v483_v5  ;;  %v507_v35 = vmul.f32 %v776_v9, %v483_v5 }
  0x6a   : > { %1431 = vst [vmem:[#allocation11_spill] sm:$0xff] %v1219_v29  ;;  %v508_v8 = vmul.f32 %v777_v63, %v483_v5  ;;  %v509_v61 = vmul.f32 %v774_v33, %v484_v6  ;;  %v510_v7 = vmul.f32 %v775_v62, %v484_v6  ;;  %v511_v55 = vmul.f32 %v776_v9, %v484_v6 }
  0x6b   : > { %1433 = vst [vmem:[#allocation12_spill] sm:$0xff] %v1222_v58  ;;  %v512_v24 = vmul.f32 %v777_v63, %v484_v6  ;;  %v513_v56 = vmul.f32 %v774_v33, %v485_v13  ;;  %v514_v25 = vmul.f32 %v775_v62, %v485_v13  ;;  %v515_v27 = vmul.f32 %v776_v9, %v485_v13 }
  0x6c   : > { %1435 = vst [vmem:[#allocation13_spill] sm:$0xff] %v1228_v1  ;;  %v516_v57 = vmul.f32 %v777_v63, %v485_v13  ;;  %v518_v1 = vmul.f32 %v775_v62, %v486_v40  ;;  %v519_v58 = vmul.f32 %v776_v9, %v486_v40  ;;  %v520_v26 = vmul.f32 %v777_v63, %v486_v40 }
  0x6d   : > { %1437 = vst [vmem:[#allocation14_spill] sm:$0xff] %v1231_v2  ;;  %v517_v2 = vmul.f32 %v774_v33, %v486_v40  ;;  %v521_v29 = vmul.f32 %v774_v33, %v487_v51  ;;  %v522_v28 = vmul.f32 %v775_v62, %v487_v51  ;;  %v523_v32 = vmul.f32 %v776_v9, %v487_v51 }
  0x6e   : > { %v524_v0 = vmul.f32 %v777_v63, %v487_v51  ;;  %v525_v31 = vmul.f32 %v774_v33, %v488_v4  ;;  %v526_v30 = vmul.f32 %v775_v62, %v488_v4  ;;  %v527_v54 = vmul.f32 %v776_v9, %v488_v4 }
  0x6f   : > { %v528_v5 = vmul.f32 %v777_v63, %v488_v4  ;;  %v529_v53 = vadd.f32 %v497_v22, %v1133_v60  ;;  %v1235_v6 = vadd.f32 %v498_v23, %v1136_v19  ;;  %v1238_v17 = vadd.f32 %v499_v3, %v1139_v20 }
  0x70   : > { %v1241_v13 = vadd.f32 %v500_v16, %v1142_v21  ;;  %v533_v40 = vadd.f32 %v501_v15, %v1145_v59  ;;  %v534_v50 = vadd.f32 %v502_v14, %v1148_v10  ;;  %v1246_v33 = vadd.f32 %v503_v34, %v1151_v11  ;;  %v1444_v15 = vld [vmem:[#allocation9_spill] sm:$0xff] }
  0x71   : > { %v1249_v62 = vadd.f32 %v504_v52, %v1154_v36  ;;  %v537_v60 = vadd.f32 %v505_v46, %v1157_v37  ;;  %v538_v19 = vadd.f32 %v506_v18, %v1160_v38  ;;  %v1254_v20 = vadd.f32 %v507_v35, %v1163_v39  ;;  %v1446_v18 = vld [vmem:[#allocation11_spill] sm:$0xff] }
  0x72   : > { %v1257_v21 = vadd.f32 %v508_v8, %v1167_v12  ;;  %v541_v59 = vadd.f32 %v509_v61, %v1170_v41  ;;  %v542_v10 = vadd.f32 %v510_v7, %v1173_v42  ;;  %v1262_v11 = vadd.f32 %v511_v55, %v1176_v43  ;;  %v1438_v41 = vld [vmem:[#allocation15_spill] sm:$0xff]  ;;  %v1439_v42 = vld [vmem:[#allocation4_spill] sm:$0xff]  ;;  %v1440_v43 = vld [vmem:[#allocation5_spill] sm:$0xff] }
  0x73   : > { %v1265_v36 = vadd.f32 %v512_v24, %v1179_v44  ;;  %v545_v37 = vadd.f32 %v513_v56, %v1182_v45  ;;  %v1269_v38 = vadd.f32 %v514_v25, %v1185_v47  ;;  %v1272_v39 = vadd.f32 %v515_v27, %v1188_v48  ;;  %v1441_v44 = vld [vmem:[#allocation6_spill] sm:$0xff]  ;;  %v1442_v45 = vld [vmem:[#allocation7_spill] sm:$0xff]  ;;  %v1447_v61 = vld [vmem:[#allocation12_spill] sm:$0xff] }
  0x74   : > { %v1275_v12 = vadd.f32 %v516_v57, %v1191_v49  ;;  %v549_v9 = vadd.f32 %v517_v2, %v1438_v41  ;;  %v1279_v63 = vadd.f32 %v518_v1, %v1439_v42  ;;  %v1282_v51 = vadd.f32 %v519_v58, %v1440_v43  ;;  %v1443_v49 = vld [vmem:[#allocation8_spill] sm:$0xff]  ;;  %v1448_v25 = vld [vmem:[#allocation13_spill] sm:$0xff] }
  0x75   : > { %v1285_v4 = vadd.f32 %v520_v26, %v1441_v44  ;;  %v553_v47 = vadd.f32 %v521_v29, %v1442_v45  ;;  %v565_v22 = vand.u32 2147483647, %v529_v53  ;;  %v566_v48 = vand.u32 2147483647, %v1235_v6  ;;  %v1445_v53 = vld [vmem:[#allocation10_spill] sm:$0xff] }
  0x76   : > { %v567_v23 = vand.u32 2147483647, %v1238_v17  ;;  %v1291_v3 = vadd.f32 %v522_v28, %v1443_v49  ;;  %v568_v2 = vand.u32 2147483647, %v1241_v13  ;;  %v569_v1 = vand.u32 2147483647, %v533_v40 }
  0x77   : > { %v570_v16 = vand.u32 2147483647, %v534_v50  ;;  %v1295_v58 = vadd.f32 %v523_v32, %v1444_v15  ;;  %v571_v14 = vand.u32 2147483647, %v1246_v33  ;;  %v572_v34 = vand.u32 2147483647, %v1249_v62 }
  0x78   : > { %v573_v29 = vand.u32 2147483647, %v537_v60  ;;  %v1300_v52 = vadd.f32 %v524_v0, %v1445_v53  ;;  %v574_v46 = vand.u32 2147483647, %v538_v19  ;;  %v575_v17 = vand.u32 2147483647, %v1254_v20 }
  0x79   : > { %v576_v28 = vand.u32 2147483647, %v1257_v21  ;;  %v557_v35 = vadd.f32 %v525_v31, %v1446_v18  ;;  %v577_v8 = vand.u32 2147483647, %v541_v59  ;;  %v578_v50 = vand.u32 2147483647, %v542_v10 }
  0x7a   : > { %v579_v32 = vand.u32 2147483647, %v1262_v11  ;;  %v1307_v7 = vadd.f32 %v526_v30, %v1447_v61  ;;  %v580_v55 = vand.u32 2147483647, %v1265_v36  ;;  %v581_v24 = vand.u32 2147483647, %v545_v37 }
  0x7b   : > { %v582_v56 = vand.u32 2147483647, %v1269_v38  ;;  %v1312_v27 = vadd.f32 %v527_v54, %v1448_v25  ;;  %v583_v57 = vand.u32 2147483647, %v1272_v39  ;;  %v584_v26 = vand.u32 2147483647, %v1275_v12 }
  0x7c   : > { %v585_v31 = vand.u32 2147483647, %v549_v9  ;;  %v1449_v0 = vld [vmem:[#allocation14_spill] sm:$0xff]  ;;  %v586_v13 = vand.u32 2147483647, %v1279_v63  ;;  %v598_v33 = vsel %vm597_vm1, %v565_v22, 0.0 }
  0x7d   : > { %v1317_v6 = vadd.f32 %v528_v5, %v1449_v0  ;;  %v587_v30 = vand.u32 2147483647, %v1282_v51  ;;  %v588_v40 = vand.u32 2147483647, %v1285_v4  ;;  %v599_v54 = vsel %vm597_vm1, %v569_v1, 0.0  ;;  %v563_v0 = vld [vmem:[%s1047_s7 + $0x10] sm:$0xff] }
  0x7e   : > { %v601_v62 = vsel %vm597_vm1, %v573_v29, 0.0  ;;  %v589_v60 = vand.u32 2147483647, %v553_v47  ;;  %v590_v19 = vand.u32 2147483647, %v1291_v3  ;;  %v600_v5 = vadd.f32 %v599_v54, %v598_v33 }
  0x7f   : > { %v591_v20 = vand.u32 2147483647, %v1295_v58  ;;  %v603_v21 = vsel %vm597_vm1, %v577_v8, 0.0  ;;  %v613_v59 = vsel %vm597_vm1, %v566_v48, 0.0  ;;  %v614_v10 = vsel %vm597_vm1, %v570_v16, 0.0 }
  0x80   : > { %v616_v11 = vsel %vm597_vm1, %v574_v46, 0.0  ;;  %v593_v36 = vand.u32 2147483647, %v557_v35  ;;  %v594_v37 = vand.u32 2147483647, %v1307_v7  ;;  %v602_v38 = vadd.f32 %v601_v62, %v600_v5 }
  0x81   : > { %v615_v39 = vadd.f32 %v614_v10, %v613_v59  ;;  %v595_v12 = vand.u32 2147483647, %v1312_v27  ;;  %v605_v41 = vsel %vm597_vm1, %v581_v24, 0.0  ;;  %v618_v9 = vsel %vm597_vm1, %v578_v50, 0.0 }
  0x82   : > { %v628_v42 = vsel %vm597_vm1, %v567_v23, 0.0  ;;  %v604_v63 = vadd.f32 %v603_v21, %v602_v38  ;;  %v629_v51 = vsel %vm597_vm1, %v571_v14, 0.0  ;;  %v631_v44 = vsel %vm597_vm1, %v575_v17, 0.0 }
  0x83   : > { %v617_v43 = vadd.f32 %v616_v11, %v615_v39  ;;  %v607_v4 = vsel %vm597_vm1, %v585_v31, 0.0  ;;  %v609_v45 = vsel %vm597_vm1, %v589_v60, 0.0  ;;  %v620_v47 = vsel %vm597_vm1, %v582_v56, 0.0  ;;  %v562_v31 = vld [vmem:[%s1047_s7 + $0x8] sm:$0xff] }
  0x84   : > { %v630_v22 = vadd.f32 %v629_v51, %v628_v42  ;;  %v606_v48 = vadd.f32 %v605_v41, %v604_v63  ;;  %v622_v3 = vsel %vm597_vm1, %v586_v13, 0.0  ;;  %v633_v1 = vsel %vm597_vm1, %v579_v32, 0.0  ;;  %v561_v32 = vld [vmem:[%s1047_s7] sm:$0xff]  ;;  %v564_v13 = vld [vmem:[%s1047_s7 + $0x18] sm:$0xff] }
  0x85   : > { %v619_v49 = vadd.f32 %v618_v9, %v617_v43  ;;  %v643_v16 = vsel %vm597_vm1, %v568_v2, 0.0  ;;  %v644_v15 = vsel %vm597_vm1, %v572_v34, 0.0  ;;  %v646_v58 = vsel %vm597_vm1, %v576_v28, 0.0 }
  0x86   : > { %v632_v23 = vadd.f32 %v631_v44, %v630_v22  ;;  %v608_v14 = vadd.f32 %v607_v4, %v606_v48  ;;  %v635_v53 = vsel %vm597_vm1, %v583_v57, 0.0  ;;  %v645_v46 = vadd.f32 %v644_v15, %v643_v16 }
  0x87   : > { %v621_v29 = vadd.f32 %v620_v47, %v619_v49  ;;  %v611_v17 = vsel %vm597_vm1, %v593_v36, 0.0  ;;  %v624_v18 = vsel %vm597_vm1, %v590_v19, 0.0  ;;  %v648_v8 = vsel %vm597_vm1, %v580_v55, 0.0 }
  0x88   : > { %v634_v35 = vadd.f32 %v633_v1, %v632_v23  ;;  %v610_v2 = vadd.f32 %v609_v45, %v608_v14  ;;  %v637_v34 = vsel %vm597_vm1, %v587_v30, 0.0  ;;  %v647_v28 = vadd.f32 %v646_v58, %v645_v46 }
  0x89   : > { %v623_v50 = vadd.f32 %v622_v3, %v621_v29  ;;  %v592_v61 = vand.u32 2147483647, %v1300_v52  ;;  %v626_v7 = vsel %vm597_vm1, %v594_v37, 0.0  ;;  %v650_v56 = vsel %vm597_vm1, %v584_v26, 0.0 }
  0x8a   : > { %v636_v24 = vadd.f32 %v635_v53, %v634_v35  ;;  %v612_v25 = vadd.f32 %v611_v17, %v610_v2  ;;  %v639_v57 = vsel %vm597_vm1, %v591_v20, 0.0  ;;  %v649_v55 = vadd.f32 %v648_v8, %v647_v28 }
  0x8b   : > { %v625_v27 = vadd.f32 %v624_v18, %v623_v50  ;;  %v596_v30 = vand.u32 2147483647, %v1317_v6  ;;  %v652_v52 = vsel %vm597_vm1, %v588_v40, 0.0  ;;  %v641_v62 = vsel %vm597_vm1, %v595_v12, 0.0 }
  0x8c   : > { %v638_v33 = vadd.f32 %v637_v34, %v636_v24  ;;  %v651_v26 = vadd.f32 %v650_v56, %v649_v55  ;;  %v658_v60 = vadd.f32 %v612_v25, %v561_v32  ;;  %v654_v20 = vsel %vm597_vm1, %v592_v61, 0.0 }
  0x8d   : > { %v627_v54 = vadd.f32 %v626_v7, %v625_v27  ;;  %v656_v6 = vsel %vm597_vm1, %v596_v30, 0.0 }
  0x8e   : > { %v640_v19 = vadd.f32 %v639_v57, %v638_v33  ;;  %v653_v5 = vadd.f32 %v652_v52, %v651_v26  ;;  %662 = vst.msk [vmem:[%s1047_s7] sm:$0xff] %vm597_vm1, %v658_v60 }
  0x8f   : > { %v659_v21 = vadd.f32 %v627_v54, %v562_v31 }
  0x90   : > { %v642_v59 = vadd.f32 %v641_v62, %v640_v19  ;;  %v655_v10 = vadd.f32 %v654_v20, %v653_v5 }
  0x91   : > { %663 = vst.msk [vmem:[%s1047_s7 + $0x8] sm:$0xff] %vm597_vm1, %v659_v21 }
  0x92   : > { %v660_v40 = vadd.f32 %v642_v59, %v563_v0  ;;  %v657_v11 = vadd.f32 %v656_v6, %v655_v10 }
  0x94   : > { %664 = vst.msk [vmem:[%s1047_s7 + $0x10] sm:$0xff] %vm597_vm1, %v660_v40  ;;  %v661_v36 = vadd.f32 %v657_v11, %v564_v13 }
  0x96   : > { %665 = vst.msk [vmem:[%s1047_s7 + $0x18] sm:$0xff] %vm597_vm1, %v661_v36 }
  0x97 PF: > { %s12_s17 = sadd.s32 1, %s929_s17   ;;  %s1450_s9 = smov %s901_s10 }
  0x98   : > { %p9_p1 = scmp.ge.s32.totalorder %s12_s17, 10   ;;  %s1451_s10 = smov %s1013_s24 }
  0x99   : > { %s1452_s11 = smov %s909_s12  ;;  %s1453_s12 = smov %s1022_s27 }
  0x9a   : > { %s1454_s13 = smov %s921_s15  ;;  %s1455_s14 = smov %s925_s16 }
  0x9b   : > { %s1456_s15 = smov %s1459_s18  ;;  %s1457_s16 = smov %s1463_s19 }
  0x9c   :  { %11 = sbr.rel (!%p9_p1) target bundleno = 5 (0x5), region = 155 }

</bundles_post_ra>
